<compile_context>
chip_gen: v6e
topology: v6e:2x2x1
jax: 0.10.0
libtpu: 0.0.40
codegen_flags: <defaults>
</compile_context>

<pallas_src>
import functools
import math

import jax
import jax.numpy as jnp
from jax.experimental import pallas as pl
from jax.experimental.pallas import tpu as pltpu


def _largest_divisor(n, cap, min_steps=1):
    """Largest d | n with d <= cap and n // d >= min_steps (fallback: 1)."""
    best = 1
    for d in range(1, min(n, cap) + 1):
        if n % d == 0 and n // d >= min_steps:
            best = d
    return best


# ---------------------------------------------------------------------------
# Kernel 1: get_obs_gp hot path (per-vertex, elementwise, VPU/EUP only)
#   - axis-angle -> 3x3 rotation (Rodrigues)
#   - local scale = 0.005 + 1e-4 * softplus(gp_scale)
#   - cov3d = M M^T with M = vert_trans[:3,:3] @ R @ diag(scale)  (symmetric,
#     only 6 unique entries stored)
#   - color = sigmoid(gp_color), opacity = smooth_clamp(gp_opacity, 0.8, 1.0)
#   - silhouette base scale = dot(vert_pos - cam_pos, cam_vec_f) * foc_scale
#
# Layout: one stacked input (19+C, NSV, 128) and one stacked output
#   (20+C, NSV, 128) f32 with NSV = V // 128; each kernel block is
#   (rows, bsv, 128) so a component slice ref[r] is a dense stack of full
#   8x128 vregs, and each grid step issues exactly 2 large DMAs.
# ---------------------------------------------------------------------------
def _obs_gp_kernel(cam_ref, in_ref, out_ref, *, C):
    # static row offsets of the stacked input
    ROT, SCALE, COLOR, OPAC, TRANS, POS = 0, 3, 6, 6 + C, 7 + C, 16 + C
    # static row offsets of the stacked output
    O_ROT, O_SCALE, O_COV, O_COLOR, O_OPAC, O_DIST = 0, 9, 12, 18, 18 + C, 19 + C

    rx = in_ref[ROT + 0]                  # (bsv, 128)
    ry = in_ref[ROT + 1]
    rz = in_ref[ROT + 2]

    # Rodrigues with one rsqrt (EUP) instead of sqrt + divides.
    # Small-angle note: for theta2 < 1e-16 (e.g. gp_rot == 0 at init) the
    # clamp makes k non-unit, but theta ~= 0 so R ~= I with O(1e-8) error.
    theta2 = rx * rx + ry * ry + rz * rz
    inv = jax.lax.rsqrt(jnp.maximum(theta2, 1e-16))
    theta = theta2 * inv                  # == sqrt(theta2) for theta2 >= eps
    kx = rx * inv
    ky = ry * inv
    kz = rz * inv
    c = jnp.cos(theta)
    s = jnp.sin(theta)
    oc = 1.0 - c
    # CSE'd products (saves ~10 VPU multiplies per tile vs naive assembly).
    ockx, ocky, ockz = oc * kx, oc * ky, oc * kz
    skx, sky, skz = s * kx, s * ky, s * kz
    oxy, oxz, oyz = ockx * ky, ockx * kz, ocky * kz
    R = [
        [c + ockx * kx, oxy - skz, oxz + sky],
        [oxy + skz, c + ocky * ky, oyz - skx],
        [oxz - sky, oyz + skx, c + ockz * kz],
    ]
    # Direct per-row stores (no concatenate / cross-sublane shuffle).
    for i in range(3):
        for j in range(3):
            out_ref[O_ROT + 3 * i + j] = R[i][j]

    # local_gp_scale = 0.005 + 0.0001 * softplus(gp_scale)
    sc = []
    for j in range(3):
        s_j = 0.005 + 0.0001 * jax.nn.softplus(in_ref[SCALE + j])
        out_ref[O_SCALE + j] = s_j
        sc.append(s_j)

    # M = T @ R @ diag(scale),  cov3d = M @ M^T  (fully unrolled, VPU-only)
    T = [[in_ref[TRANS + 3 * i + j] for j in range(3)] for i in range(3)]
    M = [[(T[i][0] * R[0][j] + T[i][1] * R[1][j] + T[i][2] * R[2][j]) * sc[j]
          for j in range(3)] for i in range(3)]
    # cov3d is symmetric: store only the 6 unique entries in row-major
    # upper-triangular order (xx, xy, xz, yy, yz, zz); mirrored by consumer.
    idx = 0
    for i in range(3):
        for j in range(i, 3):
            out_ref[O_COV + idx] = (M[i][0] * M[j][0] + M[i][1] * M[j][1]
                                    + M[i][2] * M[j][2])
            idx += 1

    for ci in range(C):
        out_ref[O_COLOR + ci] = jax.nn.sigmoid(in_ref[COLOR + ci])

    # TODO(synk): exact utils.smooth_clamp(x, lb, rb) is unknown; using the
    # standard smooth clamp lb + (rb - lb) * sigmoid(x).
    out_ref[O_OPAC] = 0.8 + (1.0 - 0.8) * jax.nn.sigmoid(in_ref[OPAC])

    # gp_dist = dot(vert_pos - cam_pos, cam_vec_f); base scale = dist * foc
    dx = in_ref[POS + 0] - cam_ref[0]
    dy = in_ref[POS + 1] - cam_ref[1]
    dz = in_ref[POS + 2] - cam_ref[2]
    gp_dist = dx * cam_ref[3] + dy * cam_ref[4] + dz * cam_ref[5]
    out_ref[O_DIST] = gp_dist * cam_ref[6]


def obs_gp(cam, packed_in, *, C, bsv_cap=256):
    """packed_in: (19+C, NSV, 128) f32 with NSV = V // 128.

    Returns a single stacked (20+C, NSV, 128) f32 array:
      rows 0:9    local_gp_rot (row-major 3x3)
      rows 9:12   local_gp_scale
      rows 12:18  obs_gp_cov3d unique entries (xx, xy, xz, yy, yz, zz)
      rows 18:18+C  gp_color (sigmoid)
      row  18+C   gp_opacity (smooth-clamped)
      row  19+C   silhouette base scale
    """
    rows_in, NSV, L = packed_in.shape
    assert L == 128 and rows_in == 19 + C
    rows_out = 20 + C
    # Largest tile <= bsv_cap sublane blocks, keeping >= 2 grid steps so the
    # parallel axis can still be sharded across v7x's two TensorCores.
    bsv = _largest_divisor(NSV, bsv_cap, min_steps=2 if NSV >= 2 else 1)

    kernel = functools.partial(_obs_gp_kernel, C=C)
    return pl.pallas_call(
        kernel,
        out_shape=jax.ShapeDtypeStruct((rows_out, NSV, 128), jnp.float32),
        grid=(NSV // bsv,),
        in_specs=[
            pl.BlockSpec(memory_space=pltpu.SMEM),                 # camera scalars
            pl.BlockSpec((rows_in, bsv, 128), lambda v: (0, v, 0)),
        ],
        out_specs=pl.BlockSpec((rows_out, bsv, 128), lambda v: (0, v, 0)),
        compiler_params=pltpu.CompilerParams(
            dimension_semantics=("parallel",)),
    )(cam, packed_in)


# ---------------------------------------------------------------------------
# Kernel 2 (fused): per-batch image reductions, spatial axis tiled on lanes.
#   mask_sum   = mask.sum((-3,-2,-1))
#   img_diff   = |render - (img*mask + (1-mask))|.sum((-3,-2,-1)) / (H*W)
#   mask_diff  = |sil_render_s - (1 - (1-dm_s)^V)|.sum((-3,-2,-1)) / (H*W)
#
# Images are reshaped to (B, C, NS, 128) with NS = H*W // 128 (a free,
# contiguous reshape).  Grid = (B, NT); the spatial tile is auto-sized up to
# 1024 sublane blocks (whole image for small inputs).  Per-lane partial sums
# live in VMEM scratch; the cross-lane (XLU) reduction happens once at the
# final step.
# ---------------------------------------------------------------------------
def _loss_kernel(img_ref, mask_ref, render_ref, dm_ref, sil_ref,
                 mask_sum_ref, img_diff_ref, *rest,
                 inv_hw, verts_cnt, sigma_n):
    md_refs = rest[:sigma_n]
    acc_m, acc_i, acc_s = rest[sigma_n:]

    t = pl.program_id(1)

    @pl.when(t == 0)
    def _():
        acc_m[...] = jnp.zeros_like(acc_m)
        acc_i[...] = jnp.zeros_like(acc_i)
        acc_s[...] = jnp.zeros_like(acc_s)

    m = mask_ref[0, 0]                                   # (bs, 128)
    acc_m[...] += m

    img = img_ref[0]                                     # (C, bs, 128)
    r = render_ref[0]                                    # (C, bs, 128)
    mb = m[None, :, :]
    person = img * mb + (1.0 - mb)
    # sum over C is a non-minor axis -> plain VPU adds, no XLU.
    acc_i[...] += jnp.sum(jnp.abs(r - person), axis=0)

    # dm' = 1 - (1 - dm)^V, computed as -expm1(V * log1p(-dm)) for stability.
    # Assumes 0 <= dm <= 1 (dm == 1 resolves via -inf; dm > 1 would NaN).
    dm = dm_ref[0]                                       # (sigma_n, bs, 128)
    sil = sil_ref[0]                                     # (sigma_n, bs, 128)
    dm_t = -jnp.expm1(verts_cnt * jnp.log1p(-dm))
    acc_s[...] += jnp.abs(sil - dm_t)

    @pl.when(t == pl.num_programs(1) - 1)
    def _():
        mask_sum_ref[0] = jnp.sum(acc_m[...])
        img_diff_ref[0] = jnp.sum(acc_i[...]) * inv_hw
        for s_idx in range(sigma_n):
            md_refs[s_idx][0] = jnp.sum(acc_s[s_idx]) * inv_hw


def fused_losses(img4, mask4, render4, dm4, sil4, *, verts_cnt, hw, bs_cap=1024):
    B, C, NS, L = img4.shape
    sigma_n = dm4.shape[1]
    assert L == 128
    # Whole image per step when it fits; capped so double-buffered blocks plus
    # accumulator scratch stay well inside 32 MiB scoped VMEM (v7x-safe).
    bs = _largest_divisor(NS, bs_cap, min_steps=1)
    NT = NS // bs

    kernel = functools.partial(
        _loss_kernel, inv_hw=1.0 / float(hw), verts_cnt=float(verts_cnt),
        sigma_n=sigma_n)

    smem_vec = pl.BlockSpec((1,), lambda b, t: (b,), memory_space=pltpu.SMEM)

    out_shape = ((jax.ShapeDtypeStruct((B,), jnp.float32),      # mask_sum
                  jax.ShapeDtypeStruct((B,), jnp.float32))      # img_diff
                 + tuple(jax.ShapeDtypeStruct((B,), jnp.float32)
                         for _ in range(sigma_n)))              # mask diffs

    outs = pl.pallas_call(
        kernel,
        out_shape=out_shape,
        grid=(B, NT),
        in_specs=[
            pl.BlockSpec((1, C, bs, 128), lambda b, t: (b, 0, t, 0)),
            pl.BlockSpec((1, 1, bs, 128), lambda b, t: (b, 0, t, 0)),
            pl.BlockSpec((1, C, bs, 128), lambda b, t: (b, 0, t, 0)),
            pl.BlockSpec((1, sigma_n, bs, 128), lambda b, t: (b, 0, t, 0)),
            pl.BlockSpec((1, sigma_n, bs, 128), lambda b, t: (b, 0, t, 0)),
        ],
        out_specs=(smem_vec, smem_vec) + (smem_vec,) * sigma_n,
        scratch_shapes=[
            pltpu.VMEM((bs, 128), jnp.float32),           # mask partial sums
            pltpu.VMEM((bs, 128), jnp.float32),           # img-diff partials
            pltpu.VMEM((sigma_n, bs, 128), jnp.float32),  # mask-diff partials
        ],
        compiler_params=pltpu.CompilerParams(
            dimension_semantics=("parallel", "arbitrary")),
    )(img4, mask4, render4, dm4, sil4)
    mask_sum, img_diff = outs[0], outs[1]
    gp_mask_diff = list(outs[2:])
    return mask_sum, img_diff, gp_mask_diff


# ---------------------------------------------------------------------------
# SoA layout helpers (one-time setup work; in training the parameters would
# simply be stored in this layout end-to-end).
# ---------------------------------------------------------------------------
def to_soa(x_vr):
    """(V, rows) -> (rows, V//128, 128)."""
    V, rows = x_vr.shape
    return x_vr.T.reshape(rows, V // 128, 128)


def from_soa(x_soa):
    """(rows, V//128, 128) -> (V, rows)."""
    rows = x_soa.shape[0]
    return x_soa.reshape(rows, -1).T


if __name__ == "__main__":
    key = jax.random.PRNGKey(0)
    V, C = 2048, 3                # verts_cnt, color_channels_cnt
    B, H, W = 2, 64, 64           # batch, image size
    HW = H * W
    sigma_n = 2
    silhouette_sigma = [1.0, 2.0]
    silhouette_opacity = [0.9, 0.7]

    # --- parameters, initialized exactly as Module.__init__ ---
    gp_rot = jnp.zeros((V, 3), jnp.float32)
    gp_scale = jnp.full((V, 3), 5.0, jnp.float32)
    gp_color = jnp.zeros((V, C), jnp.float32)
    gp_opacity = jnp.zeros((V,), jnp.float32)

    keys = jax.random.split(key, 8)
    # avatar-model outputs (unbatched vertices for simplicity)
    vert_pos = jax.random.normal(keys[0], (V, 3), jnp.float32)
    vert_trans = (jnp.eye(3, dtype=jnp.float32)[None]
                  + 0.05 * jax.random.normal(keys[1], (V, 3, 3), jnp.float32))

    img = jax.random.uniform(keys[2], (B, C, H, W), jnp.float32)
    mask = (jax.random.uniform(keys[3], (B, 1, H, W)) > 0.5).astype(jnp.float32)
    dilated_mask = [jax.random.uniform(keys[4 + i], (B, 1, H, W), jnp.float32)
                    for i in range(sigma_n)]

    # synthesized renders standing in for gaussian_utils.render_gaussian
    # TODO(synk): real 3DGS rasterization is out of scope for Pallas here.
    gp_render_img = jax.random.uniform(keys[6], (B, C, H, W), jnp.float32)
    sil_renders = [jax.random.uniform(jax.random.fold_in(keys[7], i),
                                      (B, 1, H, W), jnp.float32)
                   for i in range(sigma_n)]

    # camera scalars: pos(3), vec_f(3), foc scale factor, pad
    cam_pos = jnp.array([0.0, 0.0, 3.0], jnp.float32)
    vec_f = jnp.array([0.0, 0.0, -1.0], jnp.float32)
    foc_u = foc_d = foc_l = foc_r = 0.5
    foc_scale = math.sqrt(((foc_u + foc_d) ** 2 + (foc_l + foc_r) ** 2)
                          / (H ** 2 + W ** 2))
    cam = jnp.concatenate(
        [cam_pos, vec_f, jnp.array([foc_scale, 0.0], jnp.float32)])

    # --- stacked SoA layout for the per-vertex kernel (one-time setup; in a
    # real training loop the parameters live in this layout permanently) ---
    packed_cols = jnp.concatenate(
        [gp_rot, gp_scale, gp_color, gp_opacity[:, None],
         vert_trans.reshape(V, 9), vert_pos], axis=1)    # (V, 19 + C)
    packed_in = to_soa(packed_cols)                      # (19+C, V/128, 128)

    out_soa = obs_gp(cam, packed_in, C=C)                # (20+C, V/128, 128)

    # back to the module's natural (V, ...) layout (test-only glue)
    out_vr = from_soa(out_soa)                           # (V, 20+C)
    local_gp_rot = out_vr[:, 0:9].reshape(V, 3, 3)
    local_gp_scale = out_vr[:, 9:12]                     # (V, 3)
    cov6 = out_vr[:, 12:18]                              # xx, xy, xz, yy, yz, zz
    obs_gp_cov3d = jnp.stack([
        jnp.stack([cov6[:, 0], cov6[:, 1], cov6[:, 2]], -1),
        jnp.stack([cov6[:, 1], cov6[:, 3], cov6[:, 4]], -1),
        jnp.stack([cov6[:, 2], cov6[:, 4], cov6[:, 5]], -1)], -2)  # (V, 3, 3)
    world_gp_color = out_vr[:, 18:18 + C]                # (V, C)
    world_gp_opacity = out_vr[:, 18 + C]                 # (V,)
    gp_silhouette_base_scale = out_vr[:, 19 + C]         # (V,)

    # --- fused per-image losses (lane-dense H*W layout, free reshapes) ---
    img4 = img.reshape(B, C, HW // 128, 128)
    mask4 = mask.reshape(B, 1, HW // 128, 128)
    render4 = gp_render_img.reshape(B, C, HW // 128, 128)
    dm4 = jnp.concatenate(dilated_mask, axis=1).reshape(B, sigma_n,
                                                        HW // 128, 128)
    sil4 = jnp.concatenate(sil_renders, axis=1).reshape(B, sigma_n,
                                                        HW // 128, 128)

    mask_sum, ret_img_diff, ret_gp_mask_diff = fused_losses(
        img4, mask4, render4, dm4, sil4, verts_cnt=V, hw=HW)

    # silhouette scale / opacity selection (glue mirroring the torch code;
    # consumed by the untranslatable render_gaussian call in the original)
    gp_sil_params = []
    for i in range(sigma_n):
        gp_sil_scale = (silhouette_sigma[i]
                        * gp_silhouette_base_scale[:, None]
                        * jnp.ones((1, 3), jnp.float32))
        gp_sil_opacity = jnp.where(world_gp_opacity >= 0.01,
                                   silhouette_opacity[i], 0.0)
        gp_sil_params.append((gp_sil_scale, gp_sil_opacity))

    # --- canonical-mesh regularizers (plain-JAX glue, synthesized stats) ---
    # TODO(synk): mesh_data.{uni_lap_diff, face_norm_cos_sim, face_edge_var}
    # come from the avatar blender; synthesized here.
    vert_lap_diff = 0.01 * jax.random.normal(
        jax.random.fold_in(key, 99), (V, 3), jnp.float32)
    face_norm_cos_sim = jax.random.uniform(
        jax.random.fold_in(key, 100), (2 * V,), jnp.float32)
    face_edge_var = jax.random.uniform(
        jax.random.fold_in(key, 101), (V,), jnp.float32)
    ret_lap_diff = jnp.sum(vert_lap_diff ** 2, axis=-1).mean(-1)
    ret_nor_sim = (1.0 - face_norm_cos_sim).mean(-1)
    ret_edge_var = face_edge_var.mean(-1)

    outs = (gp_render_img, ret_img_diff, mask_sum, *ret_gp_mask_diff,
            local_gp_rot, local_gp_scale, obs_gp_cov3d, world_gp_color,
            world_gp_opacity, gp_silhouette_base_scale,
            *[p for pair in gp_sil_params for p in pair],
            ret_lap_diff, ret_nor_sim, ret_edge_var)
    jax.block_until_ready(outs)
    print("KERNEL_OK")
</pallas_src>

<mosaic_0001>
module attributes {stable_mosaic.version = 11 : i64} {
  func.func @_obs_gp_kernel(%arg0: i32, %arg1: memref<8xf32, #tpu.memory_space<smem>>, %arg2: memref<22x8x128xf32, #tpu.memory_space<vmem>>, %arg3: memref<23x8x128xf32, #tpu.memory_space<vmem>>) attributes {dimension_semantics = [#tpu.dimension_semantics<parallel>], iteration_bounds = array<i64: 2>, scalar_prefetch = 0 : i64, scratch_operands = 0 : i64, tpu.core_type = #tpu.core_type<tc>, window_params = [{transform_indices = @transform_0, window_bounds = array<i64: 8>}, {transform_indices = @transform_1, window_bounds = array<i64: 22, 8, 128>}, {transform_indices = @transform_2, window_bounds = array<i64: 23, 8, 128>}]} {
    %c0 = arith.constant 0 : index
    %c0_0 = arith.constant 0 : index
    %c0_1 = arith.constant 0 : index
    %0 = vector.load %arg2[%c0, %c0_0, %c0_1] : memref<22x8x128xf32, #tpu.memory_space<vmem>>, vector<1x8x128xf32>
    %1 = vector.shape_cast %0 : vector<1x8x128xf32> to vector<8x128xf32>
    %c1 = arith.constant 1 : index
    %c0_2 = arith.constant 0 : index
    %c0_3 = arith.constant 0 : index
    %2 = vector.load %arg2[%c1, %c0_2, %c0_3] : memref<22x8x128xf32, #tpu.memory_space<vmem>>, vector<1x8x128xf32>
    %3 = vector.shape_cast %2 : vector<1x8x128xf32> to vector<8x128xf32>
    %c2 = arith.constant 2 : index
    %c0_4 = arith.constant 0 : index
    %c0_5 = arith.constant 0 : index
    %4 = vector.load %arg2[%c2, %c0_4, %c0_5] : memref<22x8x128xf32, #tpu.memory_space<vmem>>, vector<1x8x128xf32>
    %5 = vector.shape_cast %4 : vector<1x8x128xf32> to vector<8x128xf32>
    %6 = arith.mulf %1, %1 : vector<8x128xf32>
    %7 = arith.mulf %3, %3 : vector<8x128xf32>
    %8 = arith.addf %6, %7 : vector<8x128xf32>
    %9 = arith.mulf %5, %5 : vector<8x128xf32>
    %10 = arith.addf %8, %9 : vector<8x128xf32>
    %cst = arith.constant 1.000000e-16 : f32
    %11 = vector.broadcast %cst : f32 to vector<8x128xf32>
    %12 = arith.maximumf %10, %11 : vector<8x128xf32>
    %13 = math.rsqrt %12 : vector<8x128xf32>
    %14 = arith.mulf %10, %13 : vector<8x128xf32>
    %15 = arith.mulf %1, %13 : vector<8x128xf32>
    %16 = arith.mulf %3, %13 : vector<8x128xf32>
    %17 = arith.mulf %5, %13 : vector<8x128xf32>
    %18 = math.cos %14 : vector<8x128xf32>
    %19 = math.sin %14 : vector<8x128xf32>
    %cst_6 = arith.constant 1.000000e+00 : f32
    %20 = vector.broadcast %cst_6 : f32 to vector<8x128xf32>
    %21 = arith.subf %20, %18 : vector<8x128xf32>
    %22 = arith.mulf %21, %15 : vector<8x128xf32>
    %23 = arith.mulf %21, %16 : vector<8x128xf32>
    %24 = arith.mulf %21, %17 : vector<8x128xf32>
    %25 = arith.mulf %19, %15 : vector<8x128xf32>
    %26 = arith.mulf %19, %16 : vector<8x128xf32>
    %27 = arith.mulf %19, %17 : vector<8x128xf32>
    %28 = arith.mulf %22, %16 : vector<8x128xf32>
    %29 = arith.mulf %22, %17 : vector<8x128xf32>
    %30 = arith.mulf %23, %17 : vector<8x128xf32>
    %31 = arith.mulf %22, %15 : vector<8x128xf32>
    %32 = arith.addf %18, %31 : vector<8x128xf32>
    %33 = arith.subf %28, %27 : vector<8x128xf32>
    %34 = arith.addf %29, %26 : vector<8x128xf32>
    %35 = arith.addf %28, %27 : vector<8x128xf32>
    %36 = arith.mulf %23, %16 : vector<8x128xf32>
    %37 = arith.addf %18, %36 : vector<8x128xf32>
    %38 = arith.subf %30, %25 : vector<8x128xf32>
    %39 = arith.subf %29, %26 : vector<8x128xf32>
    %40 = arith.addf %30, %25 : vector<8x128xf32>
    %41 = arith.mulf %24, %17 : vector<8x128xf32>
    %42 = arith.addf %18, %41 : vector<8x128xf32>
    %c0_7 = arith.constant 0 : index
    %c0_8 = arith.constant 0 : index
    %c0_9 = arith.constant 0 : index
    %43 = vector.load %arg3[%c0_7, %c0_8, %c0_9] : memref<23x8x128xf32, #tpu.memory_space<vmem>>, vector<1x8x128xf32>
    %44 = vector.shape_cast %43 : vector<1x8x128xf32> to vector<8x128xf32>
    %45 = vector.shape_cast %32 : vector<8x128xf32> to vector<1x8x128xf32>
    tpu.vector_store %arg3[%c0_7, %c0_8, %c0_9], %45 {strides = array<i32>} : memref<23x8x128xf32, #tpu.memory_space<vmem>>, vector<1x8x128xf32>,
    %c1_10 = arith.constant 1 : index
    %c0_11 = arith.constant 0 : index
    %c0_12 = arith.constant 0 : index
    %46 = vector.load %arg3[%c1_10, %c0_11, %c0_12] : memref<23x8x128xf32, #tpu.memory_space<vmem>>, vector<1x8x128xf32>
    %47 = vector.shape_cast %46 : vector<1x8x128xf32> to vector<8x128xf32>
    %48 = vector.shape_cast %33 : vector<8x128xf32> to vector<1x8x128xf32>
    tpu.vector_store %arg3[%c1_10, %c0_11, %c0_12], %48 {strides = array<i32>} : memref<23x8x128xf32, #tpu.memory_space<vmem>>, vector<1x8x128xf32>,
    %c2_13 = arith.constant 2 : index
    %c0_14 = arith.constant 0 : index
    %c0_15 = arith.constant 0 : index
    %49 = vector.load %arg3[%c2_13, %c0_14, %c0_15] : memref<23x8x128xf32, #tpu.memory_space<vmem>>, vector<1x8x128xf32>
    %50 = vector.shape_cast %49 : vector<1x8x128xf32> to vector<8x128xf32>
    %51 = vector.shape_cast %34 : vector<8x128xf32> to vector<1x8x128xf32>
    tpu.vector_store %arg3[%c2_13, %c0_14, %c0_15], %51 {strides = array<i32>} : memref<23x8x128xf32, #tpu.memory_space<vmem>>, vector<1x8x128xf32>,
    %c3 = arith.constant 3 : index
    %c0_16 = arith.constant 0 : index
    %c0_17 = arith.constant 0 : index
    %52 = vector.load %arg3[%c3, %c0_16, %c0_17] : memref<23x8x128xf32, #tpu.memory_space<vmem>>, vector<1x8x128xf32>
    %53 = vector.shape_cast %52 : vector<1x8x128xf32> to vector<8x128xf32>
    %54 = vector.shape_cast %35 : vector<8x128xf32> to vector<1x8x128xf32>
    tpu.vector_store %arg3[%c3, %c0_16, %c0_17], %54 {strides = array<i32>} : memref<23x8x128xf32, #tpu.memory_space<vmem>>, vector<1x8x128xf32>,
    %c4 = arith.constant 4 : index
    %c0_18 = arith.constant 0 : index
    %c0_19 = arith.constant 0 : index
    %55 = vector.load %arg3[%c4, %c0_18, %c0_19] : memref<23x8x128xf32, #tpu.memory_space<vmem>>, vector<1x8x128xf32>
    %56 = vector.shape_cast %55 : vector<1x8x128xf32> to vector<8x128xf32>
    %57 = vector.shape_cast %37 : vector<8x128xf32> to vector<1x8x128xf32>
    tpu.vector_store %arg3[%c4, %c0_18, %c0_19], %57 {strides = array<i32>} : memref<23x8x128xf32, #tpu.memory_space<vmem>>, vector<1x8x128xf32>,
    %c5 = arith.constant 5 : index
    %c0_20 = arith.constant 0 : index
    %c0_21 = arith.constant 0 : index
    %58 = vector.load %arg3[%c5, %c0_20, %c0_21] : memref<23x8x128xf32, #tpu.memory_space<vmem>>, vector<1x8x128xf32>
    %59 = vector.shape_cast %58 : vector<1x8x128xf32> to vector<8x128xf32>
    %60 = vector.shape_cast %38 : vector<8x128xf32> to vector<1x8x128xf32>
    tpu.vector_store %arg3[%c5, %c0_20, %c0_21], %60 {strides = array<i32>} : memref<23x8x128xf32, #tpu.memory_space<vmem>>, vector<1x8x128xf32>,
    %c6 = arith.constant 6 : index
    %c0_22 = arith.constant 0 : index
    %c0_23 = arith.constant 0 : index
    %61 = vector.load %arg3[%c6, %c0_22, %c0_23] : memref<23x8x128xf32, #tpu.memory_space<vmem>>, vector<1x8x128xf32>
    %62 = vector.shape_cast %61 : vector<1x8x128xf32> to vector<8x128xf32>
    %63 = vector.shape_cast %39 : vector<8x128xf32> to vector<1x8x128xf32>
    tpu.vector_store %arg3[%c6, %c0_22, %c0_23], %63 {strides = array<i32>} : memref<23x8x128xf32, #tpu.memory_space<vmem>>, vector<1x8x128xf32>,
    %c7 = arith.constant 7 : index
    %c0_24 = arith.constant 0 : index
    %c0_25 = arith.constant 0 : index
    %64 = vector.load %arg3[%c7, %c0_24, %c0_25] : memref<23x8x128xf32, #tpu.memory_space<vmem>>, vector<1x8x128xf32>
    %65 = vector.shape_cast %64 : vector<1x8x128xf32> to vector<8x128xf32>
    %66 = vector.shape_cast %40 : vector<8x128xf32> to vector<1x8x128xf32>
    tpu.vector_store %arg3[%c7, %c0_24, %c0_25], %66 {strides = array<i32>} : memref<23x8x128xf32, #tpu.memory_space<vmem>>, vector<1x8x128xf32>,
    %c8 = arith.constant 8 : index
    %c0_26 = arith.constant 0 : index
    %c0_27 = arith.constant 0 : index
    %67 = vector.load %arg3[%c8, %c0_26, %c0_27] : memref<23x8x128xf32, #tpu.memory_space<vmem>>, vector<1x8x128xf32>
    %68 = vector.shape_cast %67 : vector<1x8x128xf32> to vector<8x128xf32>
    %69 = vector.shape_cast %42 : vector<8x128xf32> to vector<1x8x128xf32>
    tpu.vector_store %arg3[%c8, %c0_26, %c0_27], %69 {strides = array<i32>} : memref<23x8x128xf32, #tpu.memory_space<vmem>>, vector<1x8x128xf32>,
    %c3_28 = arith.constant 3 : index
    %c0_29 = arith.constant 0 : index
    %c0_30 = arith.constant 0 : index
    %70 = vector.load %arg2[%c3_28, %c0_29, %c0_30] : memref<22x8x128xf32, #tpu.memory_space<vmem>>, vector<1x8x128xf32>
    %71 = vector.shape_cast %70 : vector<1x8x128xf32> to vector<8x128xf32>
    %cst_31 = arith.constant 0.000000e+00 : f32
    %72 = vector.broadcast %cst_31 : f32 to vector<8x128xf32>
    %73 = arith.maximumf %71, %72 : vector<8x128xf32>
    %74 = vector.broadcast %cst_31 : f32 to vector<8x128xf32>
    %75 = arith.subf %71, %74 : vector<8x128xf32>
    %76 = arith.cmpf one, %75, %75 : vector<8x128xf32>
    %77 = vector.broadcast %cst_31 : f32 to vector<8x128xf32>
    %78 = arith.addf %71, %77 : vector<8x128xf32>
    %79 = math.absf %75 : vector<8x128xf32>
    %cst_32 = arith.constant 0.000000e+00 : f32
    %80 = vector.broadcast %cst_32 : f32 to vector<8x128xf32>
    %81 = arith.subf %80, %79 : vector<8x128xf32>
    %82 = math.exp %81 : vector<8x128xf32>
    %83 = math.log1p %82 : vector<8x128xf32>
    %84 = arith.addf %73, %83 : vector<8x128xf32>
    %85 = arith.select %76, %78, %84 : vector<8x128xi1>, vector<8x128xf32>
    %cst_33 = arith.constant 9.99999974E-5 : f32
    %86 = vector.broadcast %cst_33 : f32 to vector<8x128xf32>
    %87 = arith.mulf %86, %85 : vector<8x128xf32>
    %cst_34 = arith.constant 5.000000e-03 : f32
    %88 = vector.broadcast %cst_34 : f32 to vector<8x128xf32>
    %89 = arith.addf %88, %87 : vector<8x128xf32>
    %c9 = arith.constant 9 : index
    %c0_35 = arith.constant 0 : index
    %c0_36 = arith.constant 0 : index
    %90 = vector.load %arg3[%c9, %c0_35, %c0_36] : memref<23x8x128xf32, #tpu.memory_space<vmem>>, vector<1x8x128xf32>
    %91 = vector.shape_cast %90 : vector<1x8x128xf32> to vector<8x128xf32>
    %92 = vector.shape_cast %89 : vector<8x128xf32> to vector<1x8x128xf32>
    tpu.vector_store %arg3[%c9, %c0_35, %c0_36], %92 {strides = array<i32>} : memref<23x8x128xf32, #tpu.memory_space<vmem>>, vector<1x8x128xf32>,
    %c4_37 = arith.constant 4 : index
    %c0_38 = arith.constant 0 : index
    %c0_39 = arith.constant 0 : index
    %93 = vector.load %arg2[%c4_37, %c0_38, %c0_39] : memref<22x8x128xf32, #tpu.memory_space<vmem>>, vector<1x8x128xf32>
    %94 = vector.shape_cast %93 : vector<1x8x128xf32> to vector<8x128xf32>
    %cst_40 = arith.constant 0.000000e+00 : f32
    %95 = vector.broadcast %cst_40 : f32 to vector<8x128xf32>
    %96 = arith.maximumf %94, %95 : vector<8x128xf32>
    %97 = vector.broadcast %cst_40 : f32 to vector<8x128xf32>
    %98 = arith.subf %94, %97 : vector<8x128xf32>
    %99 = arith.cmpf one, %98, %98 : vector<8x128xf32>
    %100 = vector.broadcast %cst_40 : f32 to vector<8x128xf32>
    %101 = arith.addf %94, %100 : vector<8x128xf32>
    %102 = math.absf %98 : vector<8x128xf32>
    %cst_41 = arith.constant 0.000000e+00 : f32
    %103 = vector.broadcast %cst_41 : f32 to vector<8x128xf32>
    %104 = arith.subf %103, %102 : vector<8x128xf32>
    %105 = math.exp %104 : vector<8x128xf32>
    %106 = math.log1p %105 : vector<8x128xf32>
    %107 = arith.addf %96, %106 : vector<8x128xf32>
    %108 = arith.select %99, %101, %107 : vector<8x128xi1>, vector<8x128xf32>
    %cst_42 = arith.constant 9.99999974E-5 : f32
    %109 = vector.broadcast %cst_42 : f32 to vector<8x128xf32>
    %110 = arith.mulf %109, %108 : vector<8x128xf32>
    %cst_43 = arith.constant 5.000000e-03 : f32
    %111 = vector.broadcast %cst_43 : f32 to vector<8x128xf32>
    %112 = arith.addf %111, %110 : vector<8x128xf32>
    %c10 = arith.constant 10 : index
    %c0_44 = arith.constant 0 : index
    %c0_45 = arith.constant 0 : index
    %113 = vector.load %arg3[%c10, %c0_44, %c0_45] : memref<23x8x128xf32, #tpu.memory_space<vmem>>, vector<1x8x128xf32>
    %114 = vector.shape_cast %113 : vector<1x8x128xf32> to vector<8x128xf32>
    %115 = vector.shape_cast %112 : vector<8x128xf32> to vector<1x8x128xf32>
    tpu.vector_store %arg3[%c10, %c0_44, %c0_45], %115 {strides = array<i32>} : memref<23x8x128xf32, #tpu.memory_space<vmem>>, vector<1x8x128xf32>,
    %c5_46 = arith.constant 5 : index
    %c0_47 = arith.constant 0 : index
    %c0_48 = arith.constant 0 : index
    %116 = vector.load %arg2[%c5_46, %c0_47, %c0_48] : memref<22x8x128xf32, #tpu.memory_space<vmem>>, vector<1x8x128xf32>
    %117 = vector.shape_cast %116 : vector<1x8x128xf32> to vector<8x128xf32>
    %cst_49 = arith.constant 0.000000e+00 : f32
    %118 = vector.broadcast %cst_49 : f32 to vector<8x128xf32>
    %119 = arith.maximumf %117, %118 : vector<8x128xf32>
    %120 = vector.broadcast %cst_49 : f32 to vector<8x128xf32>
    %121 = arith.subf %117, %120 : vector<8x128xf32>
    %122 = arith.cmpf one, %121, %121 : vector<8x128xf32>
    %123 = vector.broadcast %cst_49 : f32 to vector<8x128xf32>
    %124 = arith.addf %117, %123 : vector<8x128xf32>
    %125 = math.absf %121 : vector<8x128xf32>
    %cst_50 = arith.constant 0.000000e+00 : f32
    %126 = vector.broadcast %cst_50 : f32 to vector<8x128xf32>
    %127 = arith.subf %126, %125 : vector<8x128xf32>
    %128 = math.exp %127 : vector<8x128xf32>
    %129 = math.log1p %128 : vector<8x128xf32>
    %130 = arith.addf %119, %129 : vector<8x128xf32>
    %131 = arith.select %122, %124, %130 : vector<8x128xi1>, vector<8x128xf32>
    %cst_51 = arith.constant 9.99999974E-5 : f32
    %132 = vector.broadcast %cst_51 : f32 to vector<8x128xf32>
    %133 = arith.mulf %132, %131 : vector<8x128xf32>
    %cst_52 = arith.constant 5.000000e-03 : f32
    %134 = vector.broadcast %cst_52 : f32 to vector<8x128xf32>
    %135 = arith.addf %134, %133 : vector<8x128xf32>
    %c11 = arith.constant 11 : index
    %c0_53 = arith.constant 0 : index
    %c0_54 = arith.constant 0 : index
    %136 = vector.load %arg3[%c11, %c0_53, %c0_54] : memref<23x8x128xf32, #tpu.memory_space<vmem>>, vector<1x8x128xf32>
    %137 = vector.shape_cast %136 : vector<1x8x128xf32> to vector<8x128xf32>
    %138 = vector.shape_cast %135 : vector<8x128xf32> to vector<1x8x128xf32>
    tpu.vector_store %arg3[%c11, %c0_53, %c0_54], %138 {strides = array<i32>} : memref<23x8x128xf32, #tpu.memory_space<vmem>>, vector<1x8x128xf32>,
    %c10_55 = arith.constant 10 : index
    %c0_56 = arith.constant 0 : index
    %c0_57 = arith.constant 0 : index
    %139 = vector.load %arg2[%c10_55, %c0_56, %c0_57] : memref<22x8x128xf32, #tpu.memory_space<vmem>>, vector<1x8x128xf32>
    %140 = vector.shape_cast %139 : vector<1x8x128xf32> to vector<8x128xf32>
    %c11_58 = arith.constant 11 : index
    %c0_59 = arith.constant 0 : index
    %c0_60 = arith.constant 0 : index
    %141 = vector.load %arg2[%c11_58, %c0_59, %c0_60] : memref<22x8x128xf32, #tpu.memory_space<vmem>>, vector<1x8x128xf32>
    %142 = vector.shape_cast %141 : vector<1x8x128xf32> to vector<8x128xf32>
    %c12 = arith.constant 12 : index
    %c0_61 = arith.constant 0 : index
    %c0_62 = arith.constant 0 : index
    %143 = vector.load %arg2[%c12, %c0_61, %c0_62] : memref<22x8x128xf32, #tpu.memory_space<vmem>>, vector<1x8x128xf32>
    %144 = vector.shape_cast %143 : vector<1x8x128xf32> to vector<8x128xf32>
    %c13 = arith.constant 13 : index
    %c0_63 = arith.constant 0 : index
    %c0_64 = arith.constant 0 : index
    %145 = vector.load %arg2[%c13, %c0_63, %c0_64] : memref<22x8x128xf32, #tpu.memory_space<vmem>>, vector<1x8x128xf32>
    %146 = vector.shape_cast %145 : vector<1x8x128xf32> to vector<8x128xf32>
    %c14 = arith.constant 14 : index
    %c0_65 = arith.constant 0 : index
    %c0_66 = arith.constant 0 : index
    %147 = vector.load %arg2[%c14, %c0_65, %c0_66] : memref<22x8x128xf32, #tpu.memory_space<vmem>>, vector<1x8x128xf32>
    %148 = vector.shape_cast %147 : vector<1x8x128xf32> to vector<8x128xf32>
    %c15 = arith.constant 15 : index
    %c0_67 = arith.constant 0 : index
    %c0_68 = arith.constant 0 : index
    %149 = vector.load %arg2[%c15, %c0_67, %c0_68] : memref<22x8x128xf32, #tpu.memory_space<vmem>>, vector<1x8x128xf32>
    %150 = vector.shape_cast %149 : vector<1x8x128xf32> to vector<8x128xf32>
    %c16 = arith.constant 16 : index
    %c0_69 = arith.constant 0 : index
    %c0_70 = arith.constant 0 : index
    %151 = vector.load %arg2[%c16, %c0_69, %c0_70] : memref<22x8x128xf32, #tpu.memory_space<vmem>>, vector<1x8x128xf32>
    %152 = vector.shape_cast %151 : vector<1x8x128xf32> to vector<8x128xf32>
    %c17 = arith.constant 17 : index
    %c0_71 = arith.constant 0 : index
    %c0_72 = arith.constant 0 : index
    %153 = vector.load %arg2[%c17, %c0_71, %c0_72] : memref<22x8x128xf32, #tpu.memory_space<vmem>>, vector<1x8x128xf32>
    %154 = vector.shape_cast %153 : vector<1x8x128xf32> to vector<8x128xf32>
    %c18 = arith.constant 18 : index
    %c0_73 = arith.constant 0 : index
    %c0_74 = arith.constant 0 : index
    %155 = vector.load %arg2[%c18, %c0_73, %c0_74] : memref<22x8x128xf32, #tpu.memory_space<vmem>>, vector<1x8x128xf32>
    %156 = vector.shape_cast %155 : vector<1x8x128xf32> to vector<8x128xf32>
    %157 = arith.mulf %140, %32 : vector<8x128xf32>
    %158 = arith.mulf %142, %35 : vector<8x128xf32>
    %159 = arith.addf %157, %158 : vector<8x128xf32>
    %160 = arith.mulf %144, %39 : vector<8x128xf32>
    %161 = arith.addf %159, %160 : vector<8x128xf32>
    %162 = arith.mulf %161, %89 : vector<8x128xf32>
    %163 = arith.mulf %140, %33 : vector<8x128xf32>
    %164 = arith.mulf %142, %37 : vector<8x128xf32>
    %165 = arith.addf %163, %164 : vector<8x128xf32>
    %166 = arith.mulf %144, %40 : vector<8x128xf32>
    %167 = arith.addf %165, %166 : vector<8x128xf32>
    %168 = arith.mulf %167, %112 : vector<8x128xf32>
    %169 = arith.mulf %140, %34 : vector<8x128xf32>
    %170 = arith.mulf %142, %38 : vector<8x128xf32>
    %171 = arith.addf %169, %170 : vector<8x128xf32>
    %172 = arith.mulf %144, %42 : vector<8x128xf32>
    %173 = arith.addf %171, %172 : vector<8x128xf32>
    %174 = arith.mulf %173, %135 : vector<8x128xf32>
    %175 = arith.mulf %146, %32 : vector<8x128xf32>
    %176 = arith.mulf %148, %35 : vector<8x128xf32>
    %177 = arith.addf %175, %176 : vector<8x128xf32>
    %178 = arith.mulf %150, %39 : vector<8x128xf32>
    %179 = arith.addf %177, %178 : vector<8x128xf32>
    %180 = arith.mulf %179, %89 : vector<8x128xf32>
    %181 = arith.mulf %146, %33 : vector<8x128xf32>
    %182 = arith.mulf %148, %37 : vector<8x128xf32>
    %183 = arith.addf %181, %182 : vector<8x128xf32>
    %184 = arith.mulf %150, %40 : vector<8x128xf32>
    %185 = arith.addf %183, %184 : vector<8x128xf32>
    %186 = arith.mulf %185, %112 : vector<8x128xf32>
    %187 = arith.mulf %146, %34 : vector<8x128xf32>
    %188 = arith.mulf %148, %38 : vector<8x128xf32>
    %189 = arith.addf %187, %188 : vector<8x128xf32>
    %190 = arith.mulf %150, %42 : vector<8x128xf32>
    %191 = arith.addf %189, %190 : vector<8x128xf32>
    %192 = arith.mulf %191, %135 : vector<8x128xf32>
    %193 = arith.mulf %152, %32 : vector<8x128xf32>
    %194 = arith.mulf %154, %35 : vector<8x128xf32>
    %195 = arith.addf %193, %194 : vector<8x128xf32>
    %196 = arith.mulf %156, %39 : vector<8x128xf32>
    %197 = arith.addf %195, %196 : vector<8x128xf32>
    %198 = arith.mulf %197, %89 : vector<8x128xf32>
    %199 = arith.mulf %152, %33 : vector<8x128xf32>
    %200 = arith.mulf %154, %37 : vector<8x128xf32>
    %201 = arith.addf %199, %200 : vector<8x128xf32>
    %202 = arith.mulf %156, %40 : vector<8x128xf32>
    %203 = arith.addf %201, %202 : vector<8x128xf32>
    %204 = arith.mulf %203, %112 : vector<8x128xf32>
    %205 = arith.mulf %152, %34 : vector<8x128xf32>
    %206 = arith.mulf %154, %38 : vector<8x128xf32>
    %207 = arith.addf %205, %206 : vector<8x128xf32>
    %208 = arith.mulf %156, %42 : vector<8x128xf32>
    %209 = arith.addf %207, %208 : vector<8x128xf32>
    %210 = arith.mulf %209, %135 : vector<8x128xf32>
    %211 = arith.mulf %162, %162 : vector<8x128xf32>
    %212 = arith.mulf %168, %168 : vector<8x128xf32>
    %213 = arith.addf %211, %212 : vector<8x128xf32>
    %214 = arith.mulf %174, %174 : vector<8x128xf32>
    %215 = arith.addf %213, %214 : vector<8x128xf32>
    %c12_75 = arith.constant 12 : index
    %c0_76 = arith.constant 0 : index
    %c0_77 = arith.constant 0 : index
    %216 = vector.load %arg3[%c12_75, %c0_76, %c0_77] : memref<23x8x128xf32, #tpu.memory_space<vmem>>, vector<1x8x128xf32>
    %217 = vector.shape_cast %216 : vector<1x8x128xf32> to vector<8x128xf32>
    %218 = vector.shape_cast %215 : vector<8x128xf32> to vector<1x8x128xf32>
    tpu.vector_store %arg3[%c12_75, %c0_76, %c0_77], %218 {strides = array<i32>} : memref<23x8x128xf32, #tpu.memory_space<vmem>>, vector<1x8x128xf32>,
    %219 = arith.mulf %162, %180 : vector<8x128xf32>
    %220 = arith.mulf %168, %186 : vector<8x128xf32>
    %221 = arith.addf %219, %220 : vector<8x128xf32>
    %222 = arith.mulf %174, %192 : vector<8x128xf32>
    %223 = arith.addf %221, %222 : vector<8x128xf32>
    %c13_78 = arith.constant 13 : index
    %c0_79 = arith.constant 0 : index
    %c0_80 = arith.constant 0 : index
    %224 = vector.load %arg3[%c13_78, %c0_79, %c0_80] : memref<23x8x128xf32, #tpu.memory_space<vmem>>, vector<1x8x128xf32>
    %225 = vector.shape_cast %224 : vector<1x8x128xf32> to vector<8x128xf32>
    %226 = vector.shape_cast %223 : vector<8x128xf32> to vector<1x8x128xf32>
    tpu.vector_store %arg3[%c13_78, %c0_79, %c0_80], %226 {strides = array<i32>} : memref<23x8x128xf32, #tpu.memory_space<vmem>>, vector<1x8x128xf32>,
    %227 = arith.mulf %162, %198 : vector<8x128xf32>
    %228 = arith.mulf %168, %204 : vector<8x128xf32>
    %229 = arith.addf %227, %228 : vector<8x128xf32>
    %230 = arith.mulf %174, %210 : vector<8x128xf32>
    %231 = arith.addf %229, %230 : vector<8x128xf32>
    %c14_81 = arith.constant 14 : index
    %c0_82 = arith.constant 0 : index
    %c0_83 = arith.constant 0 : index
    %232 = vector.load %arg3[%c14_81, %c0_82, %c0_83] : memref<23x8x128xf32, #tpu.memory_space<vmem>>, vector<1x8x128xf32>
    %233 = vector.shape_cast %232 : vector<1x8x128xf32> to vector<8x128xf32>
    %234 = vector.shape_cast %231 : vector<8x128xf32> to vector<1x8x128xf32>
    tpu.vector_store %arg3[%c14_81, %c0_82, %c0_83], %234 {strides = array<i32>} : memref<23x8x128xf32, #tpu.memory_space<vmem>>, vector<1x8x128xf32>,
    %235 = arith.mulf %180, %180 : vector<8x128xf32>
    %236 = arith.mulf %186, %186 : vector<8x128xf32>
    %237 = arith.addf %235, %236 : vector<8x128xf32>
    %238 = arith.mulf %192, %192 : vector<8x128xf32>
    %239 = arith.addf %237, %238 : vector<8x128xf32>
    %c15_84 = arith.constant 15 : index
    %c0_85 = arith.constant 0 : index
    %c0_86 = arith.constant 0 : index
    %240 = vector.load %arg3[%c15_84, %c0_85, %c0_86] : memref<23x8x128xf32, #tpu.memory_space<vmem>>, vector<1x8x128xf32>
    %241 = vector.shape_cast %240 : vector<1x8x128xf32> to vector<8x128xf32>
    %242 = vector.shape_cast %239 : vector<8x128xf32> to vector<1x8x128xf32>
    tpu.vector_store %arg3[%c15_84, %c0_85, %c0_86], %242 {strides = array<i32>} : memref<23x8x128xf32, #tpu.memory_space<vmem>>, vector<1x8x128xf32>,
    %243 = arith.mulf %180, %198 : vector<8x128xf32>
    %244 = arith.mulf %186, %204 : vector<8x128xf32>
    %245 = arith.addf %243, %244 : vector<8x128xf32>
    %246 = arith.mulf %192, %210 : vector<8x128xf32>
    %247 = arith.addf %245, %246 : vector<8x128xf32>
    %c16_87 = arith.constant 16 : index
    %c0_88 = arith.constant 0 : index
    %c0_89 = arith.constant 0 : index
    %248 = vector.load %arg3[%c16_87, %c0_88, %c0_89] : memref<23x8x128xf32, #tpu.memory_space<vmem>>, vector<1x8x128xf32>
    %249 = vector.shape_cast %248 : vector<1x8x128xf32> to vector<8x128xf32>
    %250 = vector.shape_cast %247 : vector<8x128xf32> to vector<1x8x128xf32>
    tpu.vector_store %arg3[%c16_87, %c0_88, %c0_89], %250 {strides = array<i32>} : memref<23x8x128xf32, #tpu.memory_space<vmem>>, vector<1x8x128xf32>,
    %251 = arith.mulf %198, %198 : vector<8x128xf32>
    %252 = arith.mulf %204, %204 : vector<8x128xf32>
    %253 = arith.addf %251, %252 : vector<8x128xf32>
    %254 = arith.mulf %210, %210 : vector<8x128xf32>
    %255 = arith.addf %253, %254 : vector<8x128xf32>
    %c17_90 = arith.constant 17 : index
    %c0_91 = arith.constant 0 : index
    %c0_92 = arith.constant 0 : index
    %256 = vector.load %arg3[%c17_90, %c0_91, %c0_92] : memref<23x8x128xf32, #tpu.memory_space<vmem>>, vector<1x8x128xf32>
    %257 = vector.shape_cast %256 : vector<1x8x128xf32> to vector<8x128xf32>
    %258 = vector.shape_cast %255 : vector<8x128xf32> to vector<1x8x128xf32>
    tpu.vector_store %arg3[%c17_90, %c0_91, %c0_92], %258 {strides = array<i32>} : memref<23x8x128xf32, #tpu.memory_space<vmem>>, vector<1x8x128xf32>,
    %c6_93 = arith.constant 6 : index
    %c0_94 = arith.constant 0 : index
    %c0_95 = arith.constant 0 : index
    %259 = vector.load %arg2[%c6_93, %c0_94, %c0_95] : memref<22x8x128xf32, #tpu.memory_space<vmem>>, vector<1x8x128xf32>
    %260 = vector.shape_cast %259 : vector<1x8x128xf32> to vector<8x128xf32>
    %261 = arith.negf %260 : vector<8x128xf32>
    %262 = math.exp %261 : vector<8x128xf32>
    %cst_96 = arith.constant 1.000000e+00 : f32
    %263 = vector.broadcast %cst_96 : f32 to vector<8x128xf32>
    %264 = arith.addf %263, %262 : vector<8x128xf32>
    %265 = arith.divf %263, %264 : vector<8x128xf32>
    %c18_97 = arith.constant 18 : index
    %c0_98 = arith.constant 0 : index
    %c0_99 = arith.constant 0 : index
    %266 = vector.load %arg3[%c18_97, %c0_98, %c0_99] : memref<23x8x128xf32, #tpu.memory_space<vmem>>, vector<1x8x128xf32>
    %267 = vector.shape_cast %266 : vector<1x8x128xf32> to vector<8x128xf32>
    %268 = vector.shape_cast %265 : vector<8x128xf32> to vector<1x8x128xf32>
    tpu.vector_store %arg3[%c18_97, %c0_98, %c0_99], %268 {strides = array<i32>} : memref<23x8x128xf32, #tpu.memory_space<vmem>>, vector<1x8x128xf32>,
    %c7_100 = arith.constant 7 : index
    %c0_101 = arith.constant 0 : index
    %c0_102 = arith.constant 0 : index
    %269 = vector.load %arg2[%c7_100, %c0_101, %c0_102] : memref<22x8x128xf32, #tpu.memory_space<vmem>>, vector<1x8x128xf32>
    %270 = vector.shape_cast %269 : vector<1x8x128xf32> to vector<8x128xf32>
    %271 = arith.negf %270 : vector<8x128xf32>
    %272 = math.exp %271 : vector<8x128xf32>
    %cst_103 = arith.constant 1.000000e+00 : f32
    %273 = vector.broadcast %cst_103 : f32 to vector<8x128xf32>
    %274 = arith.addf %273, %272 : vector<8x128xf32>
    %275 = arith.divf %273, %274 : vector<8x128xf32>
    %c19 = arith.constant 19 : index
    %c0_104 = arith.constant 0 : index
    %c0_105 = arith.constant 0 : index
    %276 = vector.load %arg3[%c19, %c0_104, %c0_105] : memref<23x8x128xf32, #tpu.memory_space<vmem>>, vector<1x8x128xf32>
    %277 = vector.shape_cast %276 : vector<1x8x128xf32> to vector<8x128xf32>
    %278 = vector.shape_cast %275 : vector<8x128xf32> to vector<1x8x128xf32>
    tpu.vector_store %arg3[%c19, %c0_104, %c0_105], %278 {strides = array<i32>} : memref<23x8x128xf32, #tpu.memory_space<vmem>>, vector<1x8x128xf32>,
    %c8_106 = arith.constant 8 : index
    %c0_107 = arith.constant 0 : index
    %c0_108 = arith.constant 0 : index
    %279 = vector.load %arg2[%c8_106, %c0_107, %c0_108] : memref<22x8x128xf32, #tpu.memory_space<vmem>>, vector<1x8x128xf32>
    %280 = vector.shape_cast %279 : vector<1x8x128xf32> to vector<8x128xf32>
    %281 = arith.negf %280 : vector<8x128xf32>
    %282 = math.exp %281 : vector<8x128xf32>
    %cst_109 = arith.constant 1.000000e+00 : f32
    %283 = vector.broadcast %cst_109 : f32 to vector<8x128xf32>
    %284 = arith.addf %283, %282 : vector<8x128xf32>
    %285 = arith.divf %283, %284 : vector<8x128xf32>
    %c20 = arith.constant 20 : index
    %c0_110 = arith.constant 0 : index
    %c0_111 = arith.constant 0 : index
    %286 = vector.load %arg3[%c20, %c0_110, %c0_111] : memref<23x8x128xf32, #tpu.memory_space<vmem>>, vector<1x8x128xf32>
    %287 = vector.shape_cast %286 : vector<1x8x128xf32> to vector<8x128xf32>
    %288 = vector.shape_cast %285 : vector<8x128xf32> to vector<1x8x128xf32>
    tpu.vector_store %arg3[%c20, %c0_110, %c0_111], %288 {strides = array<i32>} : memref<23x8x128xf32, #tpu.memory_space<vmem>>, vector<1x8x128xf32>,
    %c9_112 = arith.constant 9 : index
    %c0_113 = arith.constant 0 : index
    %c0_114 = arith.constant 0 : index
    %289 = vector.load %arg2[%c9_112, %c0_113, %c0_114] : memref<22x8x128xf32, #tpu.memory_space<vmem>>, vector<1x8x128xf32>
    %290 = vector.shape_cast %289 : vector<1x8x128xf32> to vector<8x128xf32>
    %291 = arith.negf %290 : vector<8x128xf32>
    %292 = math.exp %291 : vector<8x128xf32>
    %cst_115 = arith.constant 1.000000e+00 : f32
    %293 = vector.broadcast %cst_115 : f32 to vector<8x128xf32>
    %294 = arith.addf %293, %292 : vector<8x128xf32>
    %295 = arith.divf %293, %294 : vector<8x128xf32>
    %cst_116 = arith.constant 2.000000e-01 : f32
    %296 = vector.broadcast %cst_116 : f32 to vector<8x128xf32>
    %297 = arith.mulf %296, %295 : vector<8x128xf32>
    %cst_117 = arith.constant 8.000000e-01 : f32
    %298 = vector.broadcast %cst_117 : f32 to vector<8x128xf32>
    %299 = arith.addf %298, %297 : vector<8x128xf32>
    %c21 = arith.constant 21 : index
    %c0_118 = arith.constant 0 : index
    %c0_119 = arith.constant 0 : index
    %300 = vector.load %arg3[%c21, %c0_118, %c0_119] : memref<23x8x128xf32, #tpu.memory_space<vmem>>, vector<1x8x128xf32>
    %301 = vector.shape_cast %300 : vector<1x8x128xf32> to vector<8x128xf32>
    %302 = vector.shape_cast %299 : vector<8x128xf32> to vector<1x8x128xf32>
    tpu.vector_store %arg3[%c21, %c0_118, %c0_119], %302 {strides = array<i32>} : memref<23x8x128xf32, #tpu.memory_space<vmem>>, vector<1x8x128xf32>,
    %c19_120 = arith.constant 19 : index
    %c0_121 = arith.constant 0 : index
    %c0_122 = arith.constant 0 : index
    %303 = vector.load %arg2[%c19_120, %c0_121, %c0_122] : memref<22x8x128xf32, #tpu.memory_space<vmem>>, vector<1x8x128xf32>
    %304 = vector.shape_cast %303 : vector<1x8x128xf32> to vector<8x128xf32>
    %c0_123 = arith.constant 0 : index
    %305 = memref.load %arg1[%c0_123] : memref<8xf32, #tpu.memory_space<smem>>
    %306 = vector.broadcast %305 : f32 to vector<8x128xf32>
    %307 = arith.subf %304, %306 : vector<8x128xf32>
    %c20_124 = arith.constant 20 : index
    %c0_125 = arith.constant 0 : index
    %c0_126 = arith.constant 0 : index
    %308 = vector.load %arg2[%c20_124, %c0_125, %c0_126] : memref<22x8x128xf32, #tpu.memory_space<vmem>>, vector<1x8x128xf32>
    %309 = vector.shape_cast %308 : vector<1x8x128xf32> to vector<8x128xf32>
    %c1_127 = arith.constant 1 : index
    %310 = memref.load %arg1[%c1_127] : memref<8xf32, #tpu.memory_space<smem>>
    %311 = vector.broadcast %310 : f32 to vector<8x128xf32>
    %312 = arith.subf %309, %311 : vector<8x128xf32>
    %c21_128 = arith.constant 21 : index
    %c0_129 = arith.constant 0 : index
    %c0_130 = arith.constant 0 : index
    %313 = vector.load %arg2[%c21_128, %c0_129, %c0_130] : memref<22x8x128xf32, #tpu.memory_space<vmem>>, vector<1x8x128xf32>
    %314 = vector.shape_cast %313 : vector<1x8x128xf32> to vector<8x128xf32>
    %c2_131 = arith.constant 2 : index
    %315 = memref.load %arg1[%c2_131] : memref<8xf32, #tpu.memory_space<smem>>
    %316 = vector.broadcast %315 : f32 to vector<8x128xf32>
    %317 = arith.subf %314, %316 : vector<8x128xf32>
    %c3_132 = arith.constant 3 : index
    %318 = memref.load %arg1[%c3_132] : memref<8xf32, #tpu.memory_space<smem>>
    %319 = vector.broadcast %318 : f32 to vector<8x128xf32>
    %320 = arith.mulf %307, %319 : vector<8x128xf32>
    %c4_133 = arith.constant 4 : index
    %321 = memref.load %arg1[%c4_133] : memref<8xf32, #tpu.memory_space<smem>>
    %322 = vector.broadcast %321 : f32 to vector<8x128xf32>
    %323 = arith.mulf %312, %322 : vector<8x128xf32>
    %324 = arith.addf %320, %323 : vector<8x128xf32>
    %c5_134 = arith.constant 5 : index
    %325 = memref.load %arg1[%c5_134] : memref<8xf32, #tpu.memory_space<smem>>
    %326 = vector.broadcast %325 : f32 to vector<8x128xf32>
    %327 = arith.mulf %317, %326 : vector<8x128xf32>
    %328 = arith.addf %324, %327 : vector<8x128xf32>
    %c6_135 = arith.constant 6 : index
    %329 = memref.load %arg1[%c6_135] : memref<8xf32, #tpu.memory_space<smem>>
    %330 = vector.broadcast %329 : f32 to vector<8x128xf32>
    %331 = arith.mulf %328, %330 : vector<8x128xf32>
    %c22 = arith.constant 22 : index
    %c0_136 = arith.constant 0 : index
    %c0_137 = arith.constant 0 : index
    %332 = vector.load %arg3[%c22, %c0_136, %c0_137] : memref<23x8x128xf32, #tpu.memory_space<vmem>>, vector<1x8x128xf32>
    %333 = vector.shape_cast %332 : vector<1x8x128xf32> to vector<8x128xf32>
    %334 = vector.shape_cast %331 : vector<8x128xf32> to vector<1x8x128xf32>
    tpu.vector_store %arg3[%c22, %c0_136, %c0_137], %334 {strides = array<i32>} : memref<23x8x128xf32, #tpu.memory_space<vmem>>, vector<1x8x128xf32>,
    return
  }
  func.func @transform_0(%arg0: i32) -> i32 {
    %c0_i32 = arith.constant 0 : i32
    %c0_i32_0 = arith.constant 0 : i32
    return %c0_i32 : i32
  }
  func.func @transform_1(%arg0: i32) -> (i32, i32, i32) {
    %c0_i32 = arith.constant 0 : i32
    %c0_i32_0 = arith.constant 0 : i32
    %c0_i32_1 = arith.constant 0 : i32
    return %c0_i32, %arg0, %c0_i32_0 : i32, i32, i32
  }
  func.func @transform_2(%arg0: i32) -> (i32, i32, i32) {
    %c0_i32 = arith.constant 0 : i32
    %c0_i32_0 = arith.constant 0 : i32
    %c0_i32_1 = arith.constant 0 : i32
    return %c0_i32, %arg0, %c0_i32_0 : i32, i32, i32
  }
}

</mosaic_0001>

<bundles_post_ra>
// kernel: tpu_custom_call.1
= control target key start
LH: loop header
LB: loop body
LE: loop exit
PB: predicated region body
PF: predicated region fallthrough
CT: control target
= control target key end

     0   :  { %7 = vsyncpa [#allocation5], 0  ;;  %s1492_s0 = inlined_call_operand.hbm [shape: f32[8], index: 0, kind: input, shape index: {}]   ;;  %s1493_s1 = inlined_call_operand.hbm [shape: f32[22,16,128], index: 1, kind: input, shape index: {}]   ;;  %s1494_s2 = inlined_call_operand.hbm [shape: f32[23,16,128], index: 2, kind: output, shape index: {}]  }
   0x1   :  { %8 = vsyncpa [#allocation3], 0 }
   0x2   :  { %10 = vsyncpa [#allocation3 + $0x1], 0 }
   0x3   :  { %11 = vsyncpa [#allocation4], 0 }
   0x4   :  { %13 = vsyncpa [#allocation4 + $0x1], 0  ;;  %s1112_s9 = smov 0   ;;  %s1114_s10 = smov 0  }
   0x5   :  { %s1116_s11 = smov 0   ;;  %s1118_s12 = smov 0  }
   0x6 LB: > { %s1133_s13 = sadd.s32 4294967295, %s1080_s12   ;;  %s792_s14 = sadd.s32 4294967294, %s1080_s12   ;;  %s1080_s12 = sphi %s1118_s12, %s1522_s12   ;;  %s1076_s11 = sphi %s1116_s11, %s1521_s11   ;;  %s1072_s10 = sphi %s1114_s10, %s1520_s10   ;;  %s1068_s9 = sphi %s1112_s9, %s1519_s9  }
   0x7   : > { %s1137_s15 = sadd.s32 1, %s1080_s12   ;;  %s47_s16 = sadd.s32 1, %s1076_s11 }
   0x8   : > { %s44_s17 = ssub.s32 %s1080_s12, %s1137_s15  ;;  %p54_p0 = scmp.ne.s32.totalorder %s1076_s11, %s1072_s10 }
   0x9   : > { %p45_p1 = scmp.eq.s32.totalorder %s44_s17, 0  ;;  %p55_p2 = scmp.eq.s32.totalorder %s1080_s12, 0 }
   0xa   : > { %p60_p3 = scmp.ne.s32.totalorder %s1072_s10, %s1068_s9  ;;  %p1495_p4 = scmp.eq.s32.totalorder %s1133_s13, 0 }
   0xb   : > { %s1149_s18 = scalar_select %p45_p1, %s1076_s11, %s47_s16  }
   0xc   : > { %p1151_p5 = por %p55_p2, %p54_p0  ;;  %p1157_p6 = por %p1495_p4, %p60_p3 }
   0xd   : > { %p84_p7 = scmp.eq.s32.totalorder %s1133_s13, 1  ;;  %p90_p8 = scmp.eq.s32.totalorder %s792_s14, 1 }
   0xe   : > { %s1500_s20 = scalar_select %p1157_p6, 1, 0 }
   0xf   : > { %p793_p9 = scmp.ge.s32.totalorder %s1080_s12, 1  ;;  %p97_p10 = scmp.lt.s32.totalorder %s1080_s12, 3 }
  0x10   : > { %p1164_p11 = por %p84_p7, %p54_p0  ;;  %p1168_p12 = por %p90_p8, %p60_p3 }
  0x11   : > { %p1172_p13 = pnand %p793_p9, %p97_p10  ;;  %p891_p4 = scmp.lt.s32.totalorder %s1080_s12, 2 }
  0x12   : > { %s1501_s21 = scalar_select %p1164_p11, 1, 0 }
  0x13   : > { %s1502_s22 = scalar_select %p1168_p12, 1, 0 }
  0x14   : > { %s1503_s23 = scalar_select %p1172_p13, 1, 0 }
  0x15   : > { %p878_p2 = pneg %p1172_p13  ;;  %s119_s24 = sand.u32 1, %s1076_s11  }
  0x16   : > { %s796_s25 = sshll.u32 %s1080_s12, 7  ;;  %p1504_p6 = scmp.eq.s32.totalorder %s1133_s13, 0 }
  0x17   : > { %p1186_p7 = pnand %p891_p4, %p1151_p5  ;;  %s863_s27 = smul.u32 176, %s119_s24 }
  0x18   : > { %p879_p0 = pnand %p878_p2, %p1504_p6  ;;  %s1082_s28 = smov [#allocation2]  }
  0x19   : > { %s1196_s5 = scalar_lea.hbm %s1493_s1, %s796_s25  ;;  %s123_s6 = scalar_lea.vmem [#allocation6], %s863_s27 }
  0x1a   : > { %881 = dma.hbm_to_smem (!%p879_p0), %s1492_s0, 16, %s1082_s28, [#allocation5]  }
  0x1b   : > { %s129_s7 = sshll.u32 %s123_s6, 4  ;;  %s1200_s8 = scalar_lea.sflag [#allocation3], %s119_s24  ;;  %s1198_s7 = int_to_ptr.vmem [resolvable:$true] %s129_s7 }
  0x1c   : > { %s984_s14 = scalar_lea.hbm %s1196_s5, 2816  ;;  %p986_p4 = pneg %p1186_p7 }
  0x1d   : > { %p985_p3 = scmp.ne.s32.totalorder %s1196_s5, %s984_s14  ;;  %s989_s19 = scalar_lea.hbm %s1493_s1, 5632 }
  0x1e   : > { %p990_p8 = scmp.lt.s32.totalorder %s1196_s5, %s1493_s1  ;;  %p991_p9 = scmp.lt.s32.totalorder %s989_s19, %s984_s14 }
  0x1f   : > { %p987_p5 = pnand %p986_p4, %p985_p3 }
  0x20   : > { %p992_p10 = por %p991_p9, %p990_p8 }
  0x21   : > { %p988_p6 = pneg %p987_p5 }
  0x23   : > { %p993_p2 = pnand %p992_p10, %p988_p6 }
  0x25   : > { %996 = shalt.err (!%p993_p2)
}
  0x26   : > { %s997_s24 = scalar_lea.vmem %s1198_s7, 2816  ;;  %s1083_s27 = smov [#allocation6]  }
  0x27   : > { %p998_p0 = scmp.ne.s32.totalorder %s1198_s7, %s997_s24  ;;  %s1002_s29 = sshll.u32 %s1083_s27, 4  ;;  %s1003_s29 = int_to_ptr.vmem [resolvable:$false] %s1002_s29 }
  0x28   : > { %s1004_s30 = scalar_lea.vmem %s1003_s29, 5632  ;;  %p1005_p5 = scmp.lt.s32.totalorder %s1198_s7, %s1003_s29 }
  0x29   : > { %p1000_p1 = pnand %p998_p0, %p986_p4  ;;  %p1006_p12 = scmp.lt.s32.totalorder %s1004_s30, %s997_s24 }
  0x2b   : > { %p1001_p3 = pneg %p1000_p1  ;;  %p1007_p11 = por %p1006_p12, %p1005_p5 }
  0x2d   : > { %p1008_p13 = pnand %p1007_p11, %p1001_p3 }
  0x2f   : > { %1011 = shalt.err (!%p1008_p13)
}
  0x30   : > { %s1084_s3 = smov 256   ;;  %s1085_s4 = smov 128  }
  0x31   : > { %s1086_s6 = smov 8   ;;  %p1506_p1 = scmp.ne.s32.totalorder %s1503_s23, 0 }
  0x32   : > { %885 = dma.hbm_to_vmem [thread:$0]  (!%p1186_p7), %s1196_s5, 2816, %s1198_s7, %s1200_s8, %s1084_s3, %s1085_s4, %s1086_s6  }
  0x33   : > { %141 = sbr.rel (%p1506_p1) target bundleno = 222 (0xde), region = 28  ;;  %p1507_p4 = scmp.eq.s32.totalorder (!%p1506_p1), %s1133_s13, 0 }
  0x38   : > { %1055 = dma.done.wait (%p1507_p4), [#allocation5], 16   ;;  %p1508_p6 = pmov %p1507_p4 }
  0x39   : > { %s1228_s14 = sand.u32 1, %s1072_s10   ;;  %p1509_p11 = scmp.ne.s32.totalorder %s1500_s20, 0 }
  0x3a   : > { %1057 = vsyncadd (%p1508_p6), [#allocation5], 4294967280  ;;  %s864_s16 = smul.u32 176, %s1228_s14  ;;  %s148_s17 = scalar_lea.sflag [#allocation3], %s1228_s14 }
  0x3c   : > { %s1232_s19 = scalar_lea.vmem [#allocation6], %s864_s16 }
  0x3d   : > { %1059 = dma.done.wait (%p1509_p11), %s148_s17, 2816  }
  0x3e   : > { %1061 = vsyncadd (%p1509_p11), %s148_s17, 4294964480 }
  0x3f   : > { %156 = sfence }
  0x40   : > { %v173_v0 = vld [vmem:[%s1232_s19] sm:$0xff]  ;;  %v799_v1 = vld [vmem:[%s1232_s19 + $0x8] sm:$0xff]  ;;  %v800_v2 = vld [vmem:[%s1232_s19 + $0x10] sm:$0xff]  ;;  %s665_s20 = sld [smem:[#allocation2]]  ;;  %s865_s28 = smul.u32 184, %s1228_s14 }
  0x41   : > { %v178_v3 = vmul.f32 %v173_v0, %v173_v0  ;;  %v179_v4 = vmul.f32 %v799_v1, %v799_v1  ;;  %v181_v5 = vmul.f32 %v800_v2, %v800_v2  ;;  %v1242_v7 = vld [vmem:[%s1232_s19 + $0x18] sm:$0xff]  ;;  %v1245_v8 = vld [vmem:[%s1232_s19 + $0x20] sm:$0xff]  ;;  %v1248_v9 = vld [vmem:[%s1232_s19 + $0x28] sm:$0xff]  ;;  %s852_s23 = sld [smem:[#allocation2 + $0x1]]  ;;  %s860_s27 = sshll.u32 %s1133_s13, 7 }
  0x42   : > { %v440_v11 = vand.u32 2147483647, %v1242_v7  ;;  %v464_v12 = vand.u32 2147483647, %v1245_v8  ;;  %v838_v13 = vld [vmem:[%s1232_s19 + $0x30] sm:$0xff]  ;;  %v841_v18 = vld [vmem:[%s1232_s19 + $0x38] sm:$0xff]  ;;  %vm438_vm2 = vcmp.ne.f32.partialorder %v1242_v7, %v1242_v7  ;;  %vm462_vm9 = vcmp.ne.f32.partialorder %v1245_v8, %v1245_v8  ;;  %s1443_s13 = scalar_lea.hbm %s1494_s2, %s860_s27 }
  0x43   : > { %v180_v6 = vadd.f32 %v179_v4, %v178_v3  ;;  %v488_v16 = vand.u32 2147483647, %v1248_v9  ;;  %v839_v21 = vmul.f32 -1.442695, %v838_v13  ;;  %v844_v22 = vld [vmem:[%s1232_s19 + $0x40] sm:$0xff]  ;;  %v847_v24 = vld [vmem:[%s1232_s19 + $0x48] sm:$0xff]  ;;  %vm486_vm11 = vcmp.ne.f32.partialorder %v1248_v9, %v1248_v9 }
  0x44   : > { %v441_v15 = vsub.f32 0.0, %v440_v11  ;;  %v465_v17 = vsub.f32 0.0, %v464_v12  ;;  %v842_v26 = vmul.f32 -1.442695, %v841_v18  ;;  %v845_v27 = vmul.f32 -1.442695, %v844_v22 }
  0x45   : > { %v182_v10 = vadd.f32 %v181_v5, %v180_v6  ;;  %v489_v20 = vsub.f32 0.0, %v488_v16  ;;  %s854_s26 = sld [smem:[#allocation2 + $0x2]]  ;;  %v848_v28 = vmul.f32 -1.442695, %v847_v24  ;;  %v850_v29 = vld [vmem:[%s1232_s19 + $0x98] sm:$0xff]  ;;  %v851_v31 = vld [vmem:[%s1232_s19 + $0xa0] sm:$0xff] }
  0x46   : > { %v442_v19 = vmul.f32 1.442695, %v441_v15  ;;  %v466_v23 = vmul.f32 1.442695, %v465_v17  ;;  %s1257_s5 = sld [smem:[#allocation2 + $0x3]]  ;;  %v666_v30 = vstv %s665_s20  ;;  %v853_v36 = vld [vmem:[%s1232_s19 + $0xa8] sm:$0xff] }
  0x47   : > { %v183_v14 = vmax.f32 %v182_v10, 1e-16  ;;  %v490_v25 = vmul.f32 1.442695, %v489_v20  ;;  %s856_s7 = sld [smem:[#allocation2 + $0x4]]  ;;  %v671_v32 = vstv %s852_s23  ;;  %v667_v33 = vsub.f32 %v850_v29, %v666_v30  ;;  %s1309_s24 = scalar_lea.vmem [#allocation7], %s865_s28 }
  0x48   : > { %s1261_s8 = sld [smem:[#allocation2 + $0x5]]  ;;  %v672_v35 = vsub.f32 %v851_v31, %v671_v32  ;;  %v437_v60 = vmax.f32 %v1242_v7, 0.0  ;;  %v461_v61 = vmax.f32 %v1245_v8, 0.0  ;;  %v1087_v30 = vmov 683565275   ;;  %s707_s29 = sshll.u32 %s1309_s24, 4  ;;  %s1446_s29 = int_to_ptr.vmem [resolvable:$true] %s707_s29 }
  0x49   : > { %939 = vrsqrt.f32 %v183_v14  ;;  %s1273_s25 = sld [smem:[#allocation2 + $0x6]]  ;;  %v1088_v32 = vmov 2475754826   ;;  %s695_s4 = scalar_lea.sflag [#allocation4], %s1228_s14 }
  0x4a   : > { %941 = vpow2.f32 %v442_v19  ;;  %s1012_s6 = scalar_lea.vmem %s1446_s29, 2944  ;;  %p1516_p13 = scmp.ne.s32.totalorder %s1501_s21, 0 }
  0x4b   : > { %943 = vpow2.f32 %v466_v23  ;;  %v676_v37 = vstv %s854_s26  ;;  %p1013_p12 = scmp.ne.s32.totalorder %s1446_s29, %s1012_s6  ;;  %s1093_s16 = smov [#allocation7]  }
  0x4c   : > { %945 = vpow2.f32 %v839_v21  ;;  %v679_v38 = vstv %s1257_s5  ;;  %v677_v48 = vsub.f32 %v853_v36, %v676_v37  ;;  %v1090_v37 = vmov 2102212464   ;;  %s1016_s17 = sshll.u32 %s1093_s16, 4  ;;  %s1017_s17 = int_to_ptr.vmem [resolvable:$false] %s1016_s17 }
  0x4d   : > { %947 = vpow2.f32 %v490_v25  ;;  %v682_v39 = vstv %s856_s7  ;;  %v680_v52 = vmul.f32 %v679_v38, %v667_v33  ;;  %p1014_p7 = pnand %p1013_p12, %p1516_p13  ;;  %p1019_p9 = scmp.lt.s32.totalorder %s1446_s29, %s1017_s17 }
  0x4e   : > { %949 = vpow2.f32 %v842_v26  ;;  %v683_v53 = vmul.f32 %v682_v39, %v672_v35  ;;  %v686_v57 = vstv %s1261_s8  ;;  %v1091_v39 = vmov 920167782  }
  0x4f   : > { %951 = vpow2.f32 %v845_v27  ;;  %v687_v6 = vmul.f32 %v686_v57, %v677_v48  ;;  %v690_v13 = vstv %s1273_s25  ;;  %p1015_p8 = pneg %p1014_p7 }
  0x50   : > { %953 = vpow2.f32 %v848_v28  ;;  %v684_v5 = vadd.f32 %v683_v53, %v680_v52 }
  0x52   : > { %v688_v22 = vadd.f32 %v687_v6, %v684_v5 }
  0x54   : > { %v691_v28 = vmul.f32 %v690_v13, %v688_v22 }
  0x56   : > { %v940_v34 = vpop.eup %939  ;;  %859 = vst [vmem:[%s1309_s24 + $0xb0] sm:$0xff] %v691_v28 }
  0x57   : > { %v1265_v40 = vmul.f32 %v940_v34, %v182_v10  ;;  %v1267_v41 = vmul.f32 %v940_v34, %v173_v0  ;;  %v1269_v42 = vmul.f32 %v940_v34, %v799_v1  ;;  %v1271_v43 = vmul.f32 %v940_v34, %v800_v2  ;;  %v942_v44 = vpop.eup %941 }
  0x58   : > { %v1275_v45 = vpop.eup %943  ;;  %v444_v50 = vadd.f32 1.0, %v942_v44  ;;  %v447_v56 = vmul.f32 -0.5, %v942_v44  ;;  %v450_v0 = vand.u32 2147483647, %v942_v44  ;;  %v1089_v34 = vmov 2131351028  }
  0x59   : > { %v189_v46 = vand.u32 2147483647, %v1265_v40  ;;  %v192_v47 = vand.u32 2139095040, %v1265_v40  ;;  %v946_v49 = vpop.eup %945  ;;  %v468_v51 = vadd.f32 1.0, %v1275_v45  ;;  %v471_v1 = vmul.f32 -0.5, %v1275_v45 }
  0x5a   : > { %v1280_v54 = vpop.eup %947  ;;  %955 = vlog2.f32 %v444_v50  ;;  %v626_v2 = vadd.f32 1.0, %v946_v49  ;;  %v448_v11 = vadd.f32 1.0, %v447_v56  ;;  %v474_v12 = vand.u32 2147483647, %v1275_v45 }
  0x5b   : > { %v193_v55 = vshrl.u32 %v192_v47, 23  ;;  %v950_v58 = vpop.eup %949  ;;  %v196_v59 = vand.u32 8388607, %v189_v46  ;;  %957 = vlog2.f32 %v468_v51  ;;  %v492_v4 = vadd.f32 1.0, %v1280_v54 }
  0x5c   : > { %v952_v62 = vpop.eup %951  ;;  %v636_v15 = vadd.f32 1.0, %v950_v58  ;;  %vm1292_vm1 = vcmp.lt.f32.partialorder %v450_v0, 0.0004427343  ;;  %v472_v18 = vadd.f32 1.0, %v471_v1  ;;  %v495_v21 = vmul.f32 -0.5, %v1280_v54 }
  0x5d   : > { %v801_v63 = vadd.s32 4294967169, %v193_v55  ;;  %v954_v3 = vpop.eup %953  ;;  %v197_v14 = vor.u32 8388608, %v196_v59  ;;  %959 = vlog2.f32 %v492_v4  ;;  %v646_v16 = vadd.f32 1.0, %v952_v62 }
  0x5e   : > { %961 = vrcp.f32 %v626_v2  ;;  %v656_v19 = vadd.f32 1.0, %v954_v3  ;;  %v449_v24 = vmul.f32 %v942_v44, %v448_v11  ;;  %v498_v25 = vand.u32 2147483647, %v1280_v54 }
  0x5f   : > { %v199_v10 = vadd.s32 1, %v801_v63  ;;  %963 = vrcp.f32 %v636_v15  ;;  %v1298_v27 = vshll.u32 %v197_v14, 8  ;;  %vm1302_vm3 = vcmp.lt.f32.partialorder %v474_v12, 0.0004427343 }
  0x60   : > { %965 = vrcp.f32 %v646_v16  ;;  %v473_v47 = vmul.f32 %v1275_v45, %v472_v18  ;;  %v496_v48 = vadd.f32 1.0, %v495_v21  ;;  %vm1312_vm4 = vcmp.lt.f32.partialorder %v498_v25, 0.0004427343 }
  0x61   : > { %vm200_vm0 = vcmp.gt.s32.totalorder %v199_v10, 0  ;;  %967 = vrcp.f32 %v656_v19  ;;  %v1092_v56 = vmov 1326507024   ;;  %vm191_vm13 = vcmp.lt.s32.totalorder %v1265_v40, 0 }
  0x62   : > { %v201_v20 = vsel %vm200_vm0, %v199_v10, 0  ;;  %v497_v19 = vmul.f32 %v1280_v54, %v496_v48  ;;  %vm190_vm14 = vcmp.le.f32.partialorder %v189_v46, 0.7853982 }
  0x63   : > { %v203_v23 = vand.u32 31, %v201_v20  ;;  %v202_v26 = vshrl.u32 %v201_v20, 5 }
  0x65   : > { %v204_v29 = vsub.s32 32, %v203_v23  ;;  %v206_v31 = vshll.u32 %v1087_v30, %v203_v23  ;;  %v209_v33 = vshll.u32 %v1088_v32, %v203_v23  ;;  %v212_v35 = vshll.u32 %v1089_v34, %v203_v23 }
  0x66   : > { %v215_v38 = vshll.u32 %v1090_v37, %v203_v23  ;;  %v218_v44 = vshll.u32 %v1091_v39, %v203_v23  ;;  %vm221_vm5 = vcmp.lt.s32.totalorder %v202_v26, 1  ;;  %vm222_vm6 = vcmp.lt.s32.totalorder %v202_v26, 2 }
  0x67   : > { %v205_v49 = vshrl.u32 %v1087_v30, %v204_v29  ;;  %v207_v50 = vshrl.u32 %v1088_v32, %v204_v29  ;;  %v210_v51 = vshrl.u32 %v1089_v34, %v204_v29  ;;  %v213_v52 = vshrl.u32 %v1090_v37, %v204_v29  ;;  %v956_v45 = vpop.eup %955 }
  0x68   : > { %v216_v55 = vshrl.u32 %v1091_v39, %v204_v29  ;;  %v219_v57 = vshrl.u32 %v1092_v56, %v204_v29  ;;  %vm224_vm7 = vcmp.lt.s32.totalorder %v202_v26, 4  ;;  %vm223_vm8 = vcmp.lt.s32.totalorder %v202_v26, 3  ;;  %v958_v2 = vpop.eup %957 }
  0x69   : > { %v208_v58 = vor.u32 %v207_v50, %v206_v31  ;;  %v211_v59 = vor.u32 %v210_v51, %v209_v33  ;;  %v214_v62 = vor.u32 %v213_v52, %v212_v35  ;;  %v446_v1 = vmul.f32 0.6931472, %v956_v45 }
  0x6a   : > { %v217_v63 = vor.u32 %v216_v55, %v215_v38  ;;  %v220_v0 = vor.u32 %v219_v57, %v218_v44  ;;  %v960_v14 = vpop.eup %959  ;;  %v470_v25 = vmul.f32 0.6931472, %v958_v2  ;;  %v485_v31 = vmax.f32 %v1248_v9, 0.0 }
  0x6b   : > { %v225_v3 = vsel %vm221_vm5, %v205_v49, %v208_v58  ;;  %v226_v4 = vsel %vm224_vm7, %v214_v62, 2102212464  ;;  %v229_v5 = vsel %vm221_vm5, %v208_v58, %v211_v59  ;;  %v233_v6 = vsel %vm221_vm5, %v211_v59, %v214_v62  ;;  %v962_v20 = vpop.eup %961 }
  0x6c   : > { %v227_v10 = vsel %vm223_vm8, %v211_v59, %v226_v4  ;;  %v230_v11 = vsel %vm224_vm7, %v217_v63, 920167782  ;;  %v234_v12 = vsel %vm224_vm7, %v220_v0, 1326507024  ;;  %v452_v13 = vsel %vm1292_vm1, %v449_v24, %v446_v1  ;;  %v964_v17 = vpop.eup %963  ;;  %840 = vst [vmem:[%s1309_s24 + $0x90] sm:$0xff] %v962_v20 }
  0x6d   : > { %v231_v15 = vsel %vm223_vm8, %v214_v62, %v230_v11  ;;  %v235_v16 = vsel %vm223_vm8, %v217_v63, %v234_v12  ;;  %v453_v18 = vadd.f32 %v452_v13, %v437_v60  ;;  %v228_v21 = vsel %vm222_vm6, %v225_v3, %v227_v10  ;;  %v966_v54 = vpop.eup %965  ;;  %843 = vst [vmem:[%s1309_s24 + $0x98] sm:$0xff] %v964_v17 }
  0x6e   : > { %v232_v22 = vsel %vm222_vm6, %v229_v5, %v231_v15  ;;  %v236_v23 = vsel %vm222_vm6, %v233_v6, %v235_v16  ;;  %v476_v26 = vsel %vm1302_vm3, %v473_v47, %v470_v25  ;;  %v494_v32 = vmul.f32 0.6931472, %v960_v14  ;;  %v968_v33 = vpop.eup %967  ;;  %846 = vst [vmem:[%s1309_s24 + $0xa0] sm:$0xff] %v966_v54 }
  0x6f   : > { %v1325_v24 = vmul.u32.u64.low %v1298_v27, %v236_v23  ;;  %v1326_v28 = vmul.u32.u64.high %v1298_v27, %v236_v23, %v1325_v24  ;;  %v1329_v29 = vmul.u32.u64.low %v1298_v27, %v232_v22  ;;  %v1330_v60 = vmul.u32.u64.high %v1298_v27, %v232_v22, %v1329_v29 }
  0x70   : > { %v454_v30 = vsel %vm438_vm2, %v1242_v7, %v453_v18  ;;  %v477_v35 = vadd.f32 %v476_v26, %v461_v61  ;;  %v244_v7 = vmul.u32 %v1298_v27, %v228_v21  ;;  %v500_v36 = vsel %vm1312_vm4, %v497_v19, %v494_v32 }
  0x71   : > { %v455_v34 = vmul.f32 0.0001, %v454_v30  ;;  %v659_v37 = vmul.f32 0.2, %v968_v33  ;;  %vm246_vm10 = vc.u32 %v1326_v28, %v1329_v29  ;;  %v247_v38 = vadd.s32 1, %v1330_v60 }
  0x72   : > { %v478_v61 = vsel %vm462_vm9, %v1245_v8, %v477_v35  ;;  %v501_v44 = vadd.f32 %v500_v36, %v485_v31  ;;  %vm281_vm5 = vweird.f32 %v1265_v40 }
  0x73   : > { %v1351_v39 = vadd.f32 0.005, %v455_v34  ;;  %v660_v47 = vadd.f32 0.8, %v659_v37  ;;  %v248_v27 = vsel %vm246_vm10, %v247_v38, %v1330_v60  ;;  %v479_v48 = vmul.f32 0.0001, %v478_v61 }
  0x74   : > { %v249_v49 = vadd.s32 %v248_v27, %v244_v7  ;;  %v502_v50 = vsel %vm486_vm11, %v1248_v9, %v501_v44  ;;  %v245_v9 = vadd.s32 %v1329_v29, %v1326_v28  ;;  %v823_v27 = vld [vmem:[%s1232_s19 + $0x50] sm:$0xff] }
  0x75   : > { %818 = vst [vmem:[%s1309_s24 + $0x48] sm:$0xff] %v1351_v39  ;;  %849 = vst [vmem:[%s1309_s24 + $0xa8] sm:$0xff] %v660_v47  ;;  %v1361_v51 = vadd.f32 0.005, %v479_v48  ;;  %v503_v52 = vmul.f32 0.0001, %v502_v50 }
  0x76   : > { %v250_v53 = vadd.s32 536870912, %v249_v49  ;;  %v826_v48 = vld [vmem:[%s1232_s19 + $0x68] sm:$0xff] }
  0x77   : > { %820 = vst [vmem:[%s1309_s24 + $0x50] sm:$0xff] %v1361_v51  ;;  %v1365_v55 = vadd.f32 0.005, %v503_v52 }
  0x78   : > { %v251_v8 = vshrl.u32 %v250_v53, 30 }
  0x79   : > { %822 = vst [vmem:[%s1309_s24 + $0x58] sm:$0xff] %v1365_v55 }
  0x7a   : > { %v252_v56 = vshll.u32 %v251_v8, 30  ;;  %v275_v15 = vsub.s32 4, %v251_v8 }
  0x7c   : > { %v253_v57 = vsub.s32 %v249_v49, %v252_v56  ;;  %v276_v19 = vsel %vm191_vm13, %v275_v15, %v251_v8  ;;  %v1388_v49 = vld [vmem:[%s1232_s19 + $0x80] sm:$0xff] }
  0x7d   : > { %v278_v20 = vsel %vm190_vm14, 0, %v276_v19 }
  0x7e   : > { %v255_v45 = vsub.s32 0, %v253_v57  ;;  %v385_v21 = vadd.s32 3, %v278_v20  ;;  %v282_v22 = vand.u32 3, %v278_v20 }
  0x80   : > { %v802_v58 = vmin.u32 %v255_v45, %v253_v57  ;;  %v386_v23 = vand.u32 3, %v385_v21  ;;  %vm287_vm15 = vcmp.eq.s32.totalorder %v282_v22, 2  ;;  %vm284_vm1 = vcmp.eq.s32.totalorder %v282_v22, 0  ;;  %v1397_v45 = vld [vmem:[%s1232_s19 + $0x88] sm:$0xff] }
  0x81   : > { %vm283_vm3 = vcmp.lt.s32.totalorder %v282_v22, 2 }
  0x82   : > { %v257_v59 = vclz %v802_v58  ;;  %vm391_vm0 = vcmp.eq.s32.totalorder %v386_v23, 2  ;;  %vm388_vm2 = vcmp.eq.s32.totalorder %v386_v23, 0  ;;  %vm387_vm4 = vcmp.lt.s32.totalorder %v386_v23, 2 }
  0x84   : > { %v803_v62 = vadd.s32 4294967294, %v257_v59 }
  0x86   : > { %vm804_vm12 = vcmp.lt.s32.totalorder %v803_v62, 0 }
  0x87   : > { %v260_v63 = vsel %vm804_vm12, 0, %v803_v62 }
  0x88   : > { %v261_v0 = vsub.s32 32, %v260_v63  ;;  %v262_v1 = vshll.u32 %v253_v57, %v260_v63  ;;  %v265_v2 = vsub.s32 4294967266, %v260_v63  ;;  %v824_v57 = vld [vmem:[%s1232_s19 + $0x58] sm:$0xff] }
  0x8a   : > { %v263_v3 = vshrl.u32 %v245_v9, %v261_v0  ;;  %v266_v4 = vadd.s32 127, %v265_v2  ;;  %v825_v2 = vld [vmem:[%s1232_s19 + $0x60] sm:$0xff] }
  0x8c   : > { %v264_v5 = vor.u32 %v263_v3, %v262_v1  ;;  %v267_v6 = vshll.u32 %v266_v4, 23 }
  0x8e   : > { %v268_v10 = vor.u32 4788187, %v267_v6  ;;  %v271_v11 = vcvt.s32.f32 %v264_v5 }
  0x90   : > { %v269_v12 = vand.u32 2147483647, %v268_v10 }
  0x92   : > { %v272_v13 = vmul.f32 %v271_v11, %v269_v12 }
  0x94   : > { %v273_v14 = vxor.u32 2147483648, %v272_v13 }
  0x96   : > { %v274_v16 = vsel %vm191_vm13, %v273_v14, %v272_v13  ;;  %v828_v14 = vld [vmem:[%s1232_s19 + $0x78] sm:$0xff] }
  0x97   : > { %v277_v18 = vsel %vm190_vm14, %v1265_v40, %v274_v16 }
  0x98   : > { %969 = vcosq.f32 %v277_v18 }
  0x99   : > { %971 = vsinq.f32 %v277_v18 }
  0xa5   : > { %v970_v25 = vpop.eup %969 }
  0xa6   : > { %v972_v17 = vpop.eup %971  ;;  %v288_v24 = vxor.u32 2147483648, %v970_v25 }
  0xa7   : > { %v285_v46 = vxor.u32 2147483648, %v972_v17 }
  0xa8   : > { %v289_v28 = vsel %vm287_vm15, %v288_v24, %v972_v17  ;;  %v393_v29 = vsel %vm391_vm0, %v288_v24, %v972_v17 }
  0xa9   : > { %v286_v60 = vsel %vm284_vm1, %v970_v25, %v285_v46  ;;  %v390_v54 = vsel %vm388_vm2, %v970_v25, %v285_v46 }
  0xaa   : > { %v290_v30 = vsel %vm283_vm3, %v286_v60, %v289_v28  ;;  %v394_v26 = vsel %vm387_vm4, %v390_v54, %v393_v29 }
  0xab   : > { %v291_v31 = vsel %vm281_vm5, nan, %v290_v30  ;;  %v395_v32 = vsel %vm281_vm5, nan, %v394_v26  ;;  %v831_v30 = vld [vmem:[%s1232_s19 + $0x90] sm:$0xff] }
  0xac   : > { %v396_v33 = vsub.f32 1.0, %v291_v31  ;;  %v402_v34 = vmul.f32 %v395_v32, %v1271_v43  ;;  %v401_v35 = vmul.f32 %v395_v32, %v1269_v42  ;;  %v400_v7 = vmul.f32 %v395_v32, %v1267_v41 }
  0xae   : > { %v397_v40 = vmul.f32 %v396_v33, %v1267_v41  ;;  %v398_v36 = vmul.f32 %v396_v33, %v1269_v42  ;;  %v399_v37 = vmul.f32 %v396_v33, %v1271_v43 }
  0xb0   : > { %v406_v38 = vmul.f32 %v397_v40, %v1267_v41  ;;  %v403_v61 = vmul.f32 %v397_v40, %v1269_v42  ;;  %v404_v44 = vmul.f32 %v397_v40, %v1271_v43  ;;  %v411_v47 = vmul.f32 %v398_v36, %v1269_v42  ;;  %v827_v42 = vld [vmem:[%s1232_s19 + $0x70] sm:$0xff]  ;;  %s1018_s19 = scalar_lea.vmem %s1017_s17, 5888 }
  0xb1   : > { %v405_v50 = vmul.f32 %v398_v36, %v1271_v43  ;;  %v416_v52 = vmul.f32 %v399_v37, %v1271_v43  ;;  %p1020_p10 = scmp.lt.s32.totalorder %s1018_s19, %s1012_s6 }
  0xb2   : > { %v407_v53 = vadd.f32 %v406_v38, %v291_v31  ;;  %v408_v8 = vsub.f32 %v403_v61, %v402_v34  ;;  %v1392_v41 = vadd.f32 %v404_v44, %v401_v35  ;;  %v410_v56 = vadd.f32 %v403_v61, %v402_v34 }
  0xb3   : > { %v412_v58 = vadd.f32 %v411_v47, %v291_v31  ;;  %v1399_v59 = vsub.f32 %v405_v50, %v400_v7  ;;  %v414_v62 = vsub.f32 %v404_v44, %v401_v35  ;;  %v415_v43 = vadd.f32 %v405_v50, %v400_v7  ;;  %p1021_p2 = por %p1020_p10, %p1019_p9 }
  0xb4   : > { %418 = vst [vmem:[%s1309_s24] sm:$0xff] %v407_v53  ;;  %v525_v9 = vmul.f32 %v823_v27, %v407_v53  ;;  %v543_v63 = vmul.f32 %v826_v48, %v407_v53  ;;  %v561_v0 = vmul.f32 %v1388_v49, %v407_v53  ;;  %809 = vst [vmem:[%s1309_s24 + $0x8] sm:$0xff] %v408_v8 }
  0xb5   : > { %v531_v1 = vmul.f32 %v823_v27, %v408_v8  ;;  %810 = vst [vmem:[%s1309_s24 + $0x10] sm:$0xff] %v1392_v41  ;;  %811 = vst [vmem:[%s1309_s24 + $0x18] sm:$0xff] %v410_v56  ;;  %v549_v3 = vmul.f32 %v826_v48, %v408_v8  ;;  %v567_v4 = vmul.f32 %v1388_v49, %v408_v8  ;;  %p1022_p0 = pnand %p1021_p2, %p1015_p8 }
  0xb6   : > { %v526_v5 = vmul.f32 %v824_v57, %v410_v56  ;;  %v544_v6 = vmul.f32 %v827_v42, %v410_v56  ;;  %812 = vst [vmem:[%s1309_s24 + $0x20] sm:$0xff] %v412_v58  ;;  %813 = vst [vmem:[%s1309_s24 + $0x28] sm:$0xff] %v1399_v59  ;;  %v562_v10 = vmul.f32 %v1397_v45, %v410_v56 }
  0xb7   : > { %814 = vst [vmem:[%s1309_s24 + $0x30] sm:$0xff] %v414_v62  ;;  %815 = vst [vmem:[%s1309_s24 + $0x38] sm:$0xff] %v415_v43  ;;  %v532_v11 = vmul.f32 %v824_v57, %v412_v58  ;;  %v550_v12 = vmul.f32 %v827_v42, %v412_v58  ;;  %v568_v13 = vmul.f32 %v1397_v45, %v412_v58 }
  0xb8   : > { %v417_v15 = vadd.f32 %v416_v52, %v291_v31  ;;  %v527_v16 = vadd.f32 %v526_v5, %v525_v9  ;;  %v528_v18 = vmul.f32 %v825_v2, %v414_v62  ;;  %v534_v19 = vmul.f32 %v825_v2, %v415_v43 }
  0xb9   : > { %v533_v20 = vadd.f32 %v532_v11, %v531_v1  ;;  %v537_v21 = vmul.f32 %v823_v27, %v1392_v41  ;;  %v538_v22 = vmul.f32 %v824_v57, %v1399_v59  ;;  %v545_v23 = vadd.f32 %v544_v6, %v543_v63 }
  0xba   : > { %816 = vst [vmem:[%s1309_s24 + $0x40] sm:$0xff] %v417_v15  ;;  %v529_v25 = vadd.f32 %v528_v18, %v527_v16  ;;  %v540_v17 = vmul.f32 %v825_v2, %v417_v15  ;;  %v546_v24 = vmul.f32 %v828_v14, %v414_v62  ;;  %v551_v46 = vadd.f32 %v550_v12, %v549_v3 }
  0xbb   : > { %v535_v28 = vadd.f32 %v534_v19, %v533_v20  ;;  %v539_v29 = vadd.f32 %v538_v22, %v537_v21  ;;  %v552_v60 = vmul.f32 %v828_v14, %v415_v43  ;;  %v555_v54 = vmul.f32 %v826_v48, %v1392_v41 }
  0xbc   : > { %v530_v26 = vmul.f32 %v529_v25, %v1351_v39  ;;  %v547_v31 = vadd.f32 %v546_v24, %v545_v23  ;;  %v556_v32 = vmul.f32 %v827_v42, %v1399_v59  ;;  %v558_v33 = vmul.f32 %v828_v14, %v417_v15 }
  0xbd   : > { %v536_v34 = vmul.f32 %v535_v28, %v1361_v51  ;;  %v541_v35 = vadd.f32 %v540_v17, %v539_v29  ;;  %v553_v7 = vadd.f32 %v552_v60, %v551_v46  ;;  %v563_v40 = vadd.f32 %v562_v10, %v561_v0 }
  0xbe   : > { %v579_v36 = vmul.f32 %v530_v26, %v530_v26  ;;  %v548_v37 = vmul.f32 %v547_v31, %v1351_v39  ;;  %v557_v38 = vadd.f32 %v556_v32, %v555_v54  ;;  %v564_v61 = vmul.f32 %v831_v30, %v414_v62 }
  0xbf   : > { %v542_v44 = vmul.f32 %v541_v35, %v1365_v55  ;;  %v580_v47 = vmul.f32 %v536_v34, %v536_v34  ;;  %v554_v27 = vmul.f32 %v553_v7, %v1361_v51  ;;  %v569_v48 = vadd.f32 %v568_v13, %v567_v4 }
  0xc0   : > { %v559_v50 = vadd.f32 %v558_v33, %v557_v38  ;;  %v586_v52 = vmul.f32 %v548_v37, %v530_v26  ;;  %v565_v53 = vadd.f32 %v564_v61, %v563_v40  ;;  %v570_v8 = vmul.f32 %v831_v30, %v415_v43 }
  0xc1   : > { %v581_v56 = vadd.f32 %v580_v47, %v579_v36  ;;  %v582_v57 = vmul.f32 %v542_v44, %v542_v44  ;;  %v587_v42 = vmul.f32 %v554_v27, %v536_v34  ;;  %v573_v58 = vmul.f32 %v1388_v49, %v1392_v41 }
  0xc2   : > { %v560_v9 = vmul.f32 %v559_v50, %v1365_v55  ;;  %v566_v62 = vmul.f32 %v565_v53, %v1351_v39  ;;  %v571_v63 = vadd.f32 %v570_v8, %v569_v48  ;;  %v574_v0 = vmul.f32 %v1397_v45, %v1399_v59 }
  0xc3   : > { %v583_v1 = vadd.f32 %v582_v57, %v581_v56  ;;  %v588_v2 = vadd.f32 %v587_v42, %v586_v52  ;;  %v576_v3 = vmul.f32 %v831_v30, %v417_v15  ;;  %v600_v4 = vmul.f32 %v548_v37, %v548_v37 }
  0xc4   : > { %v589_v43 = vmul.f32 %v560_v9, %v542_v44  ;;  %v572_v5 = vmul.f32 %v571_v63, %v1361_v51  ;;  %v575_v6 = vadd.f32 %v574_v0, %v573_v58  ;;  %v593_v10 = vmul.f32 %v566_v62, %v530_v26 }
  0xc5   : > { %832 = vst [vmem:[%s1309_s24 + $0x60] sm:$0xff] %v583_v1  ;;  %v601_v49 = vmul.f32 %v554_v27, %v554_v27  ;;  %v603_v41 = vmul.f32 %v560_v9, %v560_v9  ;;  %v607_v39 = vmul.f32 %v566_v62, %v548_v37  ;;  %v614_v11 = vmul.f32 %v566_v62, %v566_v62 }
  0xc6   : > { %v590_v12 = vadd.f32 %v589_v43, %v588_v2  ;;  %v577_v13 = vadd.f32 %v576_v3, %v575_v6  ;;  %v594_v45 = vmul.f32 %v572_v5, %v536_v34  ;;  %v608_v59 = vmul.f32 %v572_v5, %v554_v27 }
  0xc7   : > { %v602_v14 = vadd.f32 %v601_v49, %v600_v4  ;;  %v615_v15 = vmul.f32 %v572_v5, %v572_v5 }
  0xc8   : > { %833 = vst [vmem:[%s1309_s24 + $0x68] sm:$0xff] %v590_v12  ;;  %v578_v51 = vmul.f32 %v577_v13, %v1365_v55  ;;  %v595_v16 = vadd.f32 %v594_v45, %v593_v10  ;;  %v609_v18 = vadd.f32 %v608_v59, %v607_v39 }
  0xc9   : > { %v604_v19 = vadd.f32 %v603_v41, %v602_v14  ;;  %v616_v20 = vadd.f32 %v615_v15, %v614_v11 }
  0xca   : > { %v596_v21 = vmul.f32 %v578_v51, %v542_v44  ;;  %v610_v22 = vmul.f32 %v578_v51, %v560_v9  ;;  %v617_v23 = vmul.f32 %v578_v51, %v578_v51 }
  0xcb   : > { %835 = vst [vmem:[%s1309_s24 + $0x78] sm:$0xff] %v604_v19 }
  0xcc   : > { %v597_v55 = vadd.f32 %v596_v21, %v595_v16  ;;  %v611_v25 = vadd.f32 %v610_v22, %v609_v18  ;;  %v618_v17 = vadd.f32 %v617_v23, %v616_v20 }
  0xce   : > { %834 = vst [vmem:[%s1309_s24 + $0x70] sm:$0xff] %v597_v55  ;;  %836 = vst [vmem:[%s1309_s24 + $0x80] sm:$0xff] %v611_v25 }
  0xcf   : > { %837 = vst [vmem:[%s1309_s24 + $0x88] sm:$0xff] %v618_v17 }
  0xd0   : > { %1025 = shalt.err (!%p1022_p0)
}
  0xd1   : > { %s1026_s20 = scalar_lea.hbm %s1443_s13, 2944  ;;  %s1030_s5 = scalar_lea.hbm %s1494_s2, 5888 }
  0xd2   : > { %p1027_p3 = scmp.ne.s32.totalorder %s1443_s13, %s1026_s20  ;;  %p1031_p4 = scmp.lt.s32.totalorder %s1443_s13, %s1494_s2 }
  0xd3   : > { %p1032_p6 = scmp.lt.s32.totalorder %s1030_s5, %s1026_s20 }
  0xd4   : > { %p1028_p5 = pnand %p1027_p3, %p1516_p13 }
  0xd5   : > { %p1033_p11 = por %p1032_p6, %p1031_p4 }
  0xd6   : > { %p1029_p1 = pneg %p1028_p5 }
  0xd8   : > { %p1034_p12 = pnand %p1033_p11, %p1029_p1 }
  0xda   : > { %1037 = shalt.err (!%p1034_p12)
}
  0xdb   : > { %s1094_s25 = smov 128   ;;  %s1095_s28 = smov 256  }
  0xdc   : > { %s1096_s24 = smov 8  }
  0xdd   : > { %876 = dma.vmem_to_hbm [thread:$0]  (%p1516_p13), %s1446_s29, 2944, %s1443_s13, %s695_s4, %s1094_s25, %s1095_s28, %s1096_s24  }
  0xde PF: > { %s722_s27 = sand.u32 1, %s1068_s9   ;;  %p1517_p7 = scmp.ne.s32.totalorder %s1502_s22, 0 }
  0xdf   : > { %p1518_p8 = scmp.ge.s32.totalorder %s1080_s12, 2  ;;  %s723_s30 = scalar_lea.sflag [#allocation4], %s722_s27 }
  0xe1   : > { %p887_p9 = pnand %p1518_p8, %p1517_p7 }
  0xe3   : > { %p888_p10 = pneg %p887_p9 }
  0xe5   : > { %1063 = dma.done.wait (%p888_p10), %s723_s30, 2944  }
  0xe6   : > { %1065 = vsyncadd (%p888_p10), %s723_s30, 4294964352  ;;  %p16_p2 = scmp.ge.s32.totalorder %s1137_s15, 4   ;;  %s1519_s9 = smov %s1072_s10 }
  0xe7   : > { %s1520_s10 = smov %s1076_s11  ;;  %s1521_s11 = smov %s1149_s18 }
  0xe8   : > { %s1522_s12 = smov %s1137_s15  ;;  %18 = sbr.rel (!%p16_p2) target bundleno = 6 (0x6), region = 121 }
  0xed   :  { %728 = vsyncpa [#allocation3], 1 }
  0xee   :  { %730 = vsyncpa [#allocation3 + $0x1], 1 }
  0xef   :  { %731 = vsyncpa [#allocation4], 1 }
  0xf0   :  { %733 = vsyncpa [#allocation4 + $0x1], 1 }
  0xf1   :  { %734 = vsyncpa [#allocation5], 1 }
  0xf2   :  { %736 = vsyncpa [#allocation5 + $0x1], 1 }

</bundles_post_ra>
